<compile_context>
chip_gen: v7x
topology: tpu7x:2x2x1
jax: 0.10.0
libtpu: 0.0.40
codegen_flags: <defaults>
</compile_context>

<pallas_src>
import functools

import jax
import jax.numpy as jnp
import numpy as np
from jax.experimental import pallas as pl
from jax.experimental.pallas import tpu as pltpu


# --------------------------------------------------------------------------
# Pallas kernel: fused bidirectional LSTM + FC over one (T*Bp, .) slab.
# --------------------------------------------------------------------------
def _bilstm_fc_kernel(x_ref,                       # (T*Bp, D)
                      wih_ref, b_ref,              # (D, 8H), (1, 8H)  packed fwd|bwd
                      whh_f_ref, whh_b_ref,        # (H, 4H) each
                      wfc_f_ref, wfc_b_ref,        # (H, Op) each (w_fc split, lane-padded)
                      bfc_ref,                     # (1, Op)
                      out_ref,                     # (T*Bp, Op)
                      xg, hf, hb,                  # VMEM scratch
                      *, T, Bp, H):
    H4 = 4 * H

    # 1) Fused input projection for BOTH directions in one MXU pass
    #    (N = 8H fills the MXU tile instead of two half-empty passes).
    xg[...] = (jnp.dot(x_ref[...], wih_ref[...],
                       preferred_element_type=jnp.float32) + b_ref[...])

    # PyTorch LSTM gate order: i, f, g, o.
    def cell(g, c_prev):
        i = jax.nn.sigmoid(g[:, 0:H])
        f = jax.nn.sigmoid(g[:, H:2 * H])
        gg = jnp.tanh(g[:, 2 * H:3 * H])
        o = jax.nn.sigmoid(g[:, 3 * H:4 * H])
        c = f * c_prev + i * gg
        h = o * jnp.tanh(c)
        return h, c

    # 2) Merged fwd/bwd recurrence: one loop of T steps, two independent
    #    chains per iteration (MXU push of one hides EUP/VPU of the other).
    def step(t, carry):
        h_f, c_f, h_b, c_b = carry
        i_f = pl.multiple_of(t * Bp, Bp)
        i_b = pl.multiple_of((T - 1 - t) * Bp, Bp)
        g_f = xg[pl.ds(i_f, Bp), 0:H4] + jnp.dot(
            h_f, whh_f_ref[...], preferred_element_type=jnp.float32)
        g_b = xg[pl.ds(i_b, Bp), H4:2 * H4] + jnp.dot(
            h_b, whh_b_ref[...], preferred_element_type=jnp.float32)
        h_f, c_f = cell(g_f, c_f)
        h_b, c_b = cell(g_b, c_b)
        hf[pl.ds(i_f, Bp), :] = h_f
        hb[pl.ds(i_b, Bp), :] = h_b
        return (h_f, c_f, h_b, c_b)

    z = jnp.zeros((Bp, H), jnp.float32)
    jax.lax.fori_loop(0, T, step, (z, z, z, z), unroll=True)

    # 3) FC without concat: y = hf @ w_fc[:H] + hb @ w_fc[H:] + b_fc
    #    (two lane-aligned dots, lane-dense Op-wide output store).
    out_ref[...] = (jnp.dot(hf[...], wfc_f_ref[...],
                            preferred_element_type=jnp.float32)
                    + jnp.dot(hb[...], wfc_b_ref[...],
                              preferred_element_type=jnp.float32)
                    + bfc_ref[...])


# --------------------------------------------------------------------------
# Wrapper: layout plumbing (transpose / pad / weight packing) + pallas_call.
# --------------------------------------------------------------------------
def _round_up(x, m):
    return ((x + m - 1) // m) * m


def mock_model_forward(x, params):
    B, T, D = x.shape
    H = params["whh_f"].shape[0]
    O = params["w_fc"].shape[1]

    Bp = _round_up(B, 8)          # sublane granule
    Op = _round_up(O, 128)        # lane-dense output store

    # ---- input: batch-first -> time-major, pad batch, flatten to 2D ------
    xT = jnp.transpose(x, (1, 0, 2))                       # (T, B, D)
    xT = jnp.pad(xT, ((0, 0), (0, Bp - B), (0, 0)))        # (T, Bp, D)
    x2 = xT.reshape(T * Bp, D)                             # (T*Bp, D)

    # ---- weight packing ---------------------------------------------------
    wih = jnp.concatenate([params["wih_f"], params["wih_b"]], axis=1)   # (D, 8H)
    b = jnp.concatenate([params["b_f"], params["b_b"]], axis=1)         # (1, 8H)
    wfc_f = jnp.pad(params["w_fc"][:H, :], ((0, 0), (0, Op - O)))       # (H, Op)
    wfc_b = jnp.pad(params["w_fc"][H:, :], ((0, 0), (0, Op - O)))       # (H, Op)
    bfc = jnp.pad(params["b_fc"], ((0, 0), (0, Op - O)))                # (1, Op)

    kernel = functools.partial(_bilstm_fc_kernel, T=T, Bp=Bp, H=H)

    # ---- explicit scoped-VMEM budget (default is only 16 MiB on v5e) -----
    f32 = 4
    io_bytes = (x2.size + wih.size + b.size
                + 2 * H * 4 * H + 2 * H * Op + Op + T * Bp * Op) * 2 * f32
    scratch_bytes = (T * Bp * 8 * H + 2 * T * Bp * H) * f32
    vmem_limit = int(min(max(2 * (io_bytes + scratch_bytes), 16 << 20), 64 << 20))

    out2 = pl.pallas_call(
        kernel,
        out_shape=jax.ShapeDtypeStruct((T * Bp, Op), jnp.float32),
        grid_spec=pltpu.PrefetchScalarGridSpec(
            num_scalar_prefetch=0,
            grid=(1,),
            in_specs=[
                pl.BlockSpec((T * Bp, D), lambda i: (0, 0)),
                pl.BlockSpec((D, 8 * H), lambda i: (0, 0)),
                pl.BlockSpec((1, 8 * H), lambda i: (0, 0)),
                pl.BlockSpec((H, 4 * H), lambda i: (0, 0)),
                pl.BlockSpec((H, 4 * H), lambda i: (0, 0)),
                pl.BlockSpec((H, Op), lambda i: (0, 0)),
                pl.BlockSpec((H, Op), lambda i: (0, 0)),
                pl.BlockSpec((1, Op), lambda i: (0, 0)),
            ],
            out_specs=pl.BlockSpec((T * Bp, Op), lambda i: (0, 0)),
            scratch_shapes=[
                pltpu.VMEM((T * Bp, 8 * H), jnp.float32),   # xg (both directions)
                pltpu.VMEM((T * Bp, H), jnp.float32),       # hf
                pltpu.VMEM((T * Bp, H), jnp.float32),       # hb
            ],
        ),
        compiler_params=pltpu.CompilerParams(
            dimension_semantics=("arbitrary",),
            vmem_limit_bytes=vmem_limit),
    )(x2, wih, b, params["whh_f"], params["whh_b"], wfc_f, wfc_b, bfc)

    # TODO(synk): on v7x the two LSTM directions could be split across the two
    # TensorCores via core_map; single-core path kept here for portability.

    out = out2.reshape(T, Bp, Op)[:, :B, :O]               # strip padding
    return jnp.transpose(out, (1, 0, 2))                   # (B, T, O)


# --------------------------------------------------------------------------
# Pure-JAX reference (mirrors torch.nn.LSTM(bidirectional) + nn.Linear).
# --------------------------------------------------------------------------
def _lstm_ref(x, wih, whh, b):
    B, T, D = x.shape
    H = whh.shape[0]

    def step(carry, xt):
        h, c = carry
        g = xt @ wih + h @ whh + b[0]
        i = jax.nn.sigmoid(g[:, :H])
        f = jax.nn.sigmoid(g[:, H:2 * H])
        gg = jnp.tanh(g[:, 2 * H:3 * H])
        o = jax.nn.sigmoid(g[:, 3 * H:])
        c = f * c + i * gg
        h = o * jnp.tanh(c)
        return (h, c), h

    h0 = jnp.zeros((B, H), jnp.float32)
    _, hs = jax.lax.scan(step, (h0, h0), jnp.transpose(x, (1, 0, 2)))
    return jnp.transpose(hs, (1, 0, 2))


def mock_model_ref(x, params):
    hf = _lstm_ref(x, params["wih_f"], params["whh_f"], params["b_f"])
    hb = _lstm_ref(x[:, ::-1], params["wih_b"], params["whh_b"], params["b_b"])[:, ::-1]
    h = jnp.concatenate([hf, hb], axis=-1)
    return h @ params["w_fc"] + params["b_fc"][0]


# --------------------------------------------------------------------------
def init_params(key, D, H, O):
    ks = jax.random.split(key, 9)
    s = 0.1
    return {
        # forward direction (W_ih^T, W_hh^T, b_ih + b_hh fused)
        "wih_f": jax.random.normal(ks[0], (D, 4 * H), jnp.float32) * s,
        "whh_f": jax.random.normal(ks[1], (H, 4 * H), jnp.float32) * s,
        "b_f":   jax.random.normal(ks[2], (1, 4 * H), jnp.float32) * s,
        # backward direction
        "wih_b": jax.random.normal(ks[3], (D, 4 * H), jnp.float32) * s,
        "whh_b": jax.random.normal(ks[4], (H, 4 * H), jnp.float32) * s,
        "b_b":   jax.random.normal(ks[5], (1, 4 * H), jnp.float32) * s,
        # fc: Linear(2H -> O)
        "w_fc":  jax.random.normal(ks[6], (2 * H, O), jnp.float32) * s,
        "b_fc":  jax.random.normal(ks[7], (1, O), jnp.float32) * s,
    }


if __name__ == "__main__":
    # Small shapes consistent with the module (input_dim, hidden_dim, output_dim).
    B, T, D, H, O = 2, 8, 16, 32, 8

    key = jax.random.PRNGKey(0)
    kx, kp = jax.random.split(key)
    x = jax.random.normal(kx, (B, T, D), jnp.float32)
    params = init_params(kp, D, H, O)

    out = jax.block_until_ready(mock_model_forward(x, params))
    ref = jax.block_until_ready(mock_model_ref(x, params))

    assert out.shape == (B, T, O), out.shape
    np.testing.assert_allclose(np.asarray(out), np.asarray(ref), atol=1e-4, rtol=1e-4)
    print("KERNEL_OK")
</pallas_src>

<mosaic_0001>
module attributes {stable_mosaic.version = 11 : i64} {
  func.func @_bilstm_fc_kernel(%arg0: i32, %arg1: memref<64x16xf32, #tpu.memory_space<vmem>>, %arg2: memref<16x256xf32, #tpu.memory_space<vmem>>, %arg3: memref<1x256xf32, #tpu.memory_space<vmem>>, %arg4: memref<32x128xf32, #tpu.memory_space<vmem>>, %arg5: memref<32x128xf32, #tpu.memory_space<vmem>>, %arg6: memref<32x128xf32, #tpu.memory_space<vmem>>, %arg7: memref<32x128xf32, #tpu.memory_space<vmem>>, %arg8: memref<1x128xf32, #tpu.memory_space<vmem>>, %arg9: memref<64x128xf32, #tpu.memory_space<vmem>>, %arg10: memref<64x256xf32, #tpu.memory_space<vmem>>, %arg11: memref<64x32xf32, #tpu.memory_space<vmem>>, %arg12: memref<64x32xf32, #tpu.memory_space<vmem>>) attributes {dimension_semantics = [#tpu.dimension_semantics<arbitrary>], iteration_bounds = array<i64: 1>, scalar_prefetch = 0 : i64, scratch_operands = 3 : i64, tpu.core_type = #tpu.core_type<tc>, window_params = [{pipeline_mode = #tpu.pipeline_mode<synchronous>, transform_indices = @transform_0, window_bounds = array<i64: 64, 16>}, {pipeline_mode = #tpu.pipeline_mode<synchronous>, transform_indices = @transform_1, window_bounds = array<i64: 16, 256>}, {pipeline_mode = #tpu.pipeline_mode<synchronous>, transform_indices = @transform_2, window_bounds = array<i64: 1, 256>}, {pipeline_mode = #tpu.pipeline_mode<synchronous>, transform_indices = @transform_3, window_bounds = array<i64: 32, 128>}, {pipeline_mode = #tpu.pipeline_mode<synchronous>, transform_indices = @transform_4, window_bounds = array<i64: 32, 128>}, {pipeline_mode = #tpu.pipeline_mode<synchronous>, transform_indices = @transform_5, window_bounds = array<i64: 32, 128>}, {pipeline_mode = #tpu.pipeline_mode<synchronous>, transform_indices = @transform_6, window_bounds = array<i64: 32, 128>}, {pipeline_mode = #tpu.pipeline_mode<synchronous>, transform_indices = @transform_7, window_bounds = array<i64: 1, 128>}, {pipeline_mode = #tpu.pipeline_mode<synchronous>, transform_indices = @transform_8, window_bounds = array<i64: 64, 128>}]} {
    %c0 = arith.constant 0 : index
    %c0_0 = arith.constant 0 : index
    %0 = vector.load %arg1[%c0, %c0_0] : memref<64x16xf32, #tpu.memory_space<vmem>>, vector<64x16xf32>
    %c0_1 = arith.constant 0 : index
    %c0_2 = arith.constant 0 : index
    %1 = vector.load %arg2[%c0_1, %c0_2] : memref<16x256xf32, #tpu.memory_space<vmem>>, vector<16x256xf32>
    %cst = arith.constant dense<0.000000e+00> : vector<64x256xf32>
    %2 = tpu.matmul %0, %1, %cst {dimension_numbers = #tpu.dot_dimension_numbers<[1], [0], [0], [1], [0, 0, 1, 1], [], []>} : vector<64x16xf32>, vector<16x256xf32>, vector<64x256xf32> -> vector<64x256xf32>
    %c0_3 = arith.constant 0 : index
    %c0_4 = arith.constant 0 : index
    %3 = vector.load %arg3[%c0_3, %c0_4] : memref<1x256xf32, #tpu.memory_space<vmem>>, vector<1x256xf32>
    %4 = vector.broadcast %3 : vector<1x256xf32> to vector<64x256xf32>
    %5 = arith.addf %2, %4 : vector<64x256xf32>
    %c0_5 = arith.constant 0 : index
    %c0_6 = arith.constant 0 : index
    %6 = vector.load %arg10[%c0_5, %c0_6] : memref<64x256xf32, #tpu.memory_space<vmem>>, vector<64x256xf32>
    tpu.vector_store %arg10[%c0_5, %c0_6], %5 {strides = array<i32>} : memref<64x256xf32, #tpu.memory_space<vmem>>, vector<64x256xf32>,
    %cst_7 = arith.constant 0.000000e+00 : f32
    %7 = vector.broadcast %cst_7 : f32 to vector<8x32xf32>
    %c0_i32 = arith.constant 0 : i32
    %c8_i32 = arith.constant 8 : i32
    %8 = arith.muli %c0_i32, %c8_i32 : i32
    %9 = tpu.assume_multiple %8, 8 : i32
    %c7_i32 = arith.constant 7 : i32
    %10 = arith.subi %c7_i32, %c0_i32 : i32
    %c8_i32_8 = arith.constant 8 : i32
    %11 = arith.muli %10, %c8_i32_8 : i32
    %12 = tpu.assume_multiple %11, 8 : i32
    %13 = arith.index_cast %9 : i32 to index
    %c0_9 = arith.constant 0 : index
    %14 = vector.load %arg10[%13, %c0_9] : memref<64x256xf32, #tpu.memory_space<vmem>>, vector<8x128xf32>
    %c0_10 = arith.constant 0 : index
    %c0_11 = arith.constant 0 : index
    %15 = vector.load %arg4[%c0_10, %c0_11] : memref<32x128xf32, #tpu.memory_space<vmem>>, vector<32x128xf32>
    %cst_12 = arith.constant dense<0.000000e+00> : vector<8x128xf32>
    %16 = tpu.matmul %7, %15, %cst_12 {dimension_numbers = #tpu.dot_dimension_numbers<[1], [0], [0], [1], [0, 0, 1, 1], [], []>} : vector<8x32xf32>, vector<32x128xf32>, vector<8x128xf32> -> vector<8x128xf32>
    %17 = arith.addf %14, %16 : vector<8x128xf32>
    %18 = arith.index_cast %12 : i32 to index
    %c128 = arith.constant 128 : index
    %19 = vector.load %arg10[%18, %c128] : memref<64x256xf32, #tpu.memory_space<vmem>>, vector<8x128xf32>
    %c0_13 = arith.constant 0 : index
    %c0_14 = arith.constant 0 : index
    %20 = vector.load %arg5[%c0_13, %c0_14] : memref<32x128xf32, #tpu.memory_space<vmem>>, vector<32x128xf32>
    %cst_15 = arith.constant dense<0.000000e+00> : vector<8x128xf32>
    %21 = tpu.matmul %7, %20, %cst_15 {dimension_numbers = #tpu.dot_dimension_numbers<[1], [0], [0], [1], [0, 0, 1, 1], [], []>} : vector<8x32xf32>, vector<32x128xf32>, vector<8x128xf32> -> vector<8x128xf32>
    %22 = arith.addf %19, %21 : vector<8x128xf32>
    %23 = vector.extract_strided_slice %17 {offsets = [0, 0], sizes = [8, 32], strides = [1, 1]} : vector<8x128xf32> to vector<8x32xf32>
    %24 = arith.negf %23 : vector<8x32xf32>
    %25 = math.exp %24 : vector<8x32xf32>
    %cst_16 = arith.constant 1.000000e+00 : f32
    %26 = vector.broadcast %cst_16 : f32 to vector<8x32xf32>
    %27 = arith.addf %26, %25 : vector<8x32xf32>
    %28 = arith.divf %26, %27 : vector<8x32xf32>
    %29 = vector.extract_strided_slice %17 {offsets = [0, 32], sizes = [8, 32], strides = [1, 1]} : vector<8x128xf32> to vector<8x32xf32>
    %30 = arith.negf %29 : vector<8x32xf32>
    %31 = math.exp %30 : vector<8x32xf32>
    %cst_17 = arith.constant 1.000000e+00 : f32
    %32 = vector.broadcast %cst_17 : f32 to vector<8x32xf32>
    %33 = arith.addf %32, %31 : vector<8x32xf32>
    %34 = arith.divf %32, %33 : vector<8x32xf32>
    %35 = vector.extract_strided_slice %17 {offsets = [0, 64], sizes = [8, 32], strides = [1, 1]} : vector<8x128xf32> to vector<8x32xf32>
    %36 = math.tanh %35 : vector<8x32xf32>
    %37 = vector.extract_strided_slice %17 {offsets = [0, 96], sizes = [8, 32], strides = [1, 1]} : vector<8x128xf32> to vector<8x32xf32>
    %38 = arith.negf %37 : vector<8x32xf32>
    %39 = math.exp %38 : vector<8x32xf32>
    %cst_18 = arith.constant 1.000000e+00 : f32
    %40 = vector.broadcast %cst_18 : f32 to vector<8x32xf32>
    %41 = arith.addf %40, %39 : vector<8x32xf32>
    %42 = arith.divf %40, %41 : vector<8x32xf32>
    %43 = arith.mulf %34, %7 : vector<8x32xf32>
    %44 = arith.mulf %28, %36 : vector<8x32xf32>
    %45 = arith.addf %43, %44 : vector<8x32xf32>
    %46 = math.tanh %45 : vector<8x32xf32>
    %47 = arith.mulf %42, %46 : vector<8x32xf32>
    %48 = vector.extract_strided_slice %22 {offsets = [0, 0], sizes = [8, 32], strides = [1, 1]} : vector<8x128xf32> to vector<8x32xf32>
    %49 = arith.negf %48 : vector<8x32xf32>
    %50 = math.exp %49 : vector<8x32xf32>
    %cst_19 = arith.constant 1.000000e+00 : f32
    %51 = vector.broadcast %cst_19 : f32 to vector<8x32xf32>
    %52 = arith.addf %51, %50 : vector<8x32xf32>
    %53 = arith.divf %51, %52 : vector<8x32xf32>
    %54 = vector.extract_strided_slice %22 {offsets = [0, 32], sizes = [8, 32], strides = [1, 1]} : vector<8x128xf32> to vector<8x32xf32>
    %55 = arith.negf %54 : vector<8x32xf32>
    %56 = math.exp %55 : vector<8x32xf32>
    %cst_20 = arith.constant 1.000000e+00 : f32
    %57 = vector.broadcast %cst_20 : f32 to vector<8x32xf32>
    %58 = arith.addf %57, %56 : vector<8x32xf32>
    %59 = arith.divf %57, %58 : vector<8x32xf32>
    %60 = vector.extract_strided_slice %22 {offsets = [0, 64], sizes = [8, 32], strides = [1, 1]} : vector<8x128xf32> to vector<8x32xf32>
    %61 = math.tanh %60 : vector<8x32xf32>
    %62 = vector.extract_strided_slice %22 {offsets = [0, 96], sizes = [8, 32], strides = [1, 1]} : vector<8x128xf32> to vector<8x32xf32>
    %63 = arith.negf %62 : vector<8x32xf32>
    %64 = math.exp %63 : vector<8x32xf32>
    %cst_21 = arith.constant 1.000000e+00 : f32
    %65 = vector.broadcast %cst_21 : f32 to vector<8x32xf32>
    %66 = arith.addf %65, %64 : vector<8x32xf32>
    %67 = arith.divf %65, %66 : vector<8x32xf32>
    %68 = arith.mulf %59, %7 : vector<8x32xf32>
    %69 = arith.mulf %53, %61 : vector<8x32xf32>
    %70 = arith.addf %68, %69 : vector<8x32xf32>
    %71 = math.tanh %70 : vector<8x32xf32>
    %72 = arith.mulf %67, %71 : vector<8x32xf32>
    %73 = arith.index_cast %9 : i32 to index
    %c0_22 = arith.constant 0 : index
    %74 = vector.load %arg11[%73, %c0_22] : memref<64x32xf32, #tpu.memory_space<vmem>>, vector<8x32xf32>
    tpu.vector_store %arg11[%73, %c0_22], %47 {strides = array<i32>} : memref<64x32xf32, #tpu.memory_space<vmem>>, vector<8x32xf32>,
    %75 = arith.index_cast %12 : i32 to index
    %c0_23 = arith.constant 0 : index
    %76 = vector.load %arg12[%75, %c0_23] : memref<64x32xf32, #tpu.memory_space<vmem>>, vector<8x32xf32>
    tpu.vector_store %arg12[%75, %c0_23], %72 {strides = array<i32>} : memref<64x32xf32, #tpu.memory_space<vmem>>, vector<8x32xf32>,
    %c1_i32 = arith.constant 1 : i32
    %c8_i32_24 = arith.constant 8 : i32
    %77 = arith.muli %c1_i32, %c8_i32_24 : i32
    %78 = tpu.assume_multiple %77, 8 : i32
    %c7_i32_25 = arith.constant 7 : i32
    %79 = arith.subi %c7_i32_25, %c1_i32 : i32
    %c8_i32_26 = arith.constant 8 : i32
    %80 = arith.muli %79, %c8_i32_26 : i32
    %81 = tpu.assume_multiple %80, 8 : i32
    %82 = arith.index_cast %78 : i32 to index
    %c0_27 = arith.constant 0 : index
    %83 = vector.load %arg10[%82, %c0_27] : memref<64x256xf32, #tpu.memory_space<vmem>>, vector<8x128xf32>
    %c0_28 = arith.constant 0 : index
    %c0_29 = arith.constant 0 : index
    %84 = vector.load %arg4[%c0_28, %c0_29] : memref<32x128xf32, #tpu.memory_space<vmem>>, vector<32x128xf32>
    %cst_30 = arith.constant dense<0.000000e+00> : vector<8x128xf32>
    %85 = tpu.matmul %47, %84, %cst_30 {dimension_numbers = #tpu.dot_dimension_numbers<[1], [0], [0], [1], [0, 0, 1, 1], [], []>} : vector<8x32xf32>, vector<32x128xf32>, vector<8x128xf32> -> vector<8x128xf32>
    %86 = arith.addf %83, %85 : vector<8x128xf32>
    %87 = arith.index_cast %81 : i32 to index
    %c128_31 = arith.constant 128 : index
    %88 = vector.load %arg10[%87, %c128_31] : memref<64x256xf32, #tpu.memory_space<vmem>>, vector<8x128xf32>
    %c0_32 = arith.constant 0 : index
    %c0_33 = arith.constant 0 : index
    %89 = vector.load %arg5[%c0_32, %c0_33] : memref<32x128xf32, #tpu.memory_space<vmem>>, vector<32x128xf32>
    %cst_34 = arith.constant dense<0.000000e+00> : vector<8x128xf32>
    %90 = tpu.matmul %72, %89, %cst_34 {dimension_numbers = #tpu.dot_dimension_numbers<[1], [0], [0], [1], [0, 0, 1, 1], [], []>} : vector<8x32xf32>, vector<32x128xf32>, vector<8x128xf32> -> vector<8x128xf32>
    %91 = arith.addf %88, %90 : vector<8x128xf32>
    %92 = vector.extract_strided_slice %86 {offsets = [0, 0], sizes = [8, 32], strides = [1, 1]} : vector<8x128xf32> to vector<8x32xf32>
    %93 = arith.negf %92 : vector<8x32xf32>
    %94 = math.exp %93 : vector<8x32xf32>
    %cst_35 = arith.constant 1.000000e+00 : f32
    %95 = vector.broadcast %cst_35 : f32 to vector<8x32xf32>
    %96 = arith.addf %95, %94 : vector<8x32xf32>
    %97 = arith.divf %95, %96 : vector<8x32xf32>
    %98 = vector.extract_strided_slice %86 {offsets = [0, 32], sizes = [8, 32], strides = [1, 1]} : vector<8x128xf32> to vector<8x32xf32>
    %99 = arith.negf %98 : vector<8x32xf32>
    %100 = math.exp %99 : vector<8x32xf32>
    %cst_36 = arith.constant 1.000000e+00 : f32
    %101 = vector.broadcast %cst_36 : f32 to vector<8x32xf32>
    %102 = arith.addf %101, %100 : vector<8x32xf32>
    %103 = arith.divf %101, %102 : vector<8x32xf32>
    %104 = vector.extract_strided_slice %86 {offsets = [0, 64], sizes = [8, 32], strides = [1, 1]} : vector<8x128xf32> to vector<8x32xf32>
    %105 = math.tanh %104 : vector<8x32xf32>
    %106 = vector.extract_strided_slice %86 {offsets = [0, 96], sizes = [8, 32], strides = [1, 1]} : vector<8x128xf32> to vector<8x32xf32>
    %107 = arith.negf %106 : vector<8x32xf32>
    %108 = math.exp %107 : vector<8x32xf32>
    %cst_37 = arith.constant 1.000000e+00 : f32
    %109 = vector.broadcast %cst_37 : f32 to vector<8x32xf32>
    %110 = arith.addf %109, %108 : vector<8x32xf32>
    %111 = arith.divf %109, %110 : vector<8x32xf32>
    %112 = arith.mulf %103, %45 : vector<8x32xf32>
    %113 = arith.mulf %97, %105 : vector<8x32xf32>
    %114 = arith.addf %112, %113 : vector<8x32xf32>
    %115 = math.tanh %114 : vector<8x32xf32>
    %116 = arith.mulf %111, %115 : vector<8x32xf32>
    %117 = vector.extract_strided_slice %91 {offsets = [0, 0], sizes = [8, 32], strides = [1, 1]} : vector<8x128xf32> to vector<8x32xf32>
    %118 = arith.negf %117 : vector<8x32xf32>
    %119 = math.exp %118 : vector<8x32xf32>
    %cst_38 = arith.constant 1.000000e+00 : f32
    %120 = vector.broadcast %cst_38 : f32 to vector<8x32xf32>
    %121 = arith.addf %120, %119 : vector<8x32xf32>
    %122 = arith.divf %120, %121 : vector<8x32xf32>
    %123 = vector.extract_strided_slice %91 {offsets = [0, 32], sizes = [8, 32], strides = [1, 1]} : vector<8x128xf32> to vector<8x32xf32>
    %124 = arith.negf %123 : vector<8x32xf32>
    %125 = math.exp %124 : vector<8x32xf32>
    %cst_39 = arith.constant 1.000000e+00 : f32
    %126 = vector.broadcast %cst_39 : f32 to vector<8x32xf32>
    %127 = arith.addf %126, %125 : vector<8x32xf32>
    %128 = arith.divf %126, %127 : vector<8x32xf32>
    %129 = vector.extract_strided_slice %91 {offsets = [0, 64], sizes = [8, 32], strides = [1, 1]} : vector<8x128xf32> to vector<8x32xf32>
    %130 = math.tanh %129 : vector<8x32xf32>
    %131 = vector.extract_strided_slice %91 {offsets = [0, 96], sizes = [8, 32], strides = [1, 1]} : vector<8x128xf32> to vector<8x32xf32>
    %132 = arith.negf %131 : vector<8x32xf32>
    %133 = math.exp %132 : vector<8x32xf32>
    %cst_40 = arith.constant 1.000000e+00 : f32
    %134 = vector.broadcast %cst_40 : f32 to vector<8x32xf32>
    %135 = arith.addf %134, %133 : vector<8x32xf32>
    %136 = arith.divf %134, %135 : vector<8x32xf32>
    %137 = arith.mulf %128, %70 : vector<8x32xf32>
    %138 = arith.mulf %122, %130 : vector<8x32xf32>
    %139 = arith.addf %137, %138 : vector<8x32xf32>
    %140 = math.tanh %139 : vector<8x32xf32>
    %141 = arith.mulf %136, %140 : vector<8x32xf32>
    %142 = arith.index_cast %78 : i32 to index
    %c0_41 = arith.constant 0 : index
    %143 = vector.load %arg11[%142, %c0_41] : memref<64x32xf32, #tpu.memory_space<vmem>>, vector<8x32xf32>
    tpu.vector_store %arg11[%142, %c0_41], %116 {strides = array<i32>} : memref<64x32xf32, #tpu.memory_space<vmem>>, vector<8x32xf32>,
    %144 = arith.index_cast %81 : i32 to index
    %c0_42 = arith.constant 0 : index
    %145 = vector.load %arg12[%144, %c0_42] : memref<64x32xf32, #tpu.memory_space<vmem>>, vector<8x32xf32>
    tpu.vector_store %arg12[%144, %c0_42], %141 {strides = array<i32>} : memref<64x32xf32, #tpu.memory_space<vmem>>, vector<8x32xf32>,
    %c2_i32 = arith.constant 2 : i32
    %c8_i32_43 = arith.constant 8 : i32
    %146 = arith.muli %c2_i32, %c8_i32_43 : i32
    %147 = tpu.assume_multiple %146, 8 : i32
    %c7_i32_44 = arith.constant 7 : i32
    %148 = arith.subi %c7_i32_44, %c2_i32 : i32
    %c8_i32_45 = arith.constant 8 : i32
    %149 = arith.muli %148, %c8_i32_45 : i32
    %150 = tpu.assume_multiple %149, 8 : i32
    %151 = arith.index_cast %147 : i32 to index
    %c0_46 = arith.constant 0 : index
    %152 = vector.load %arg10[%151, %c0_46] : memref<64x256xf32, #tpu.memory_space<vmem>>, vector<8x128xf32>
    %c0_47 = arith.constant 0 : index
    %c0_48 = arith.constant 0 : index
    %153 = vector.load %arg4[%c0_47, %c0_48] : memref<32x128xf32, #tpu.memory_space<vmem>>, vector<32x128xf32>
    %cst_49 = arith.constant dense<0.000000e+00> : vector<8x128xf32>
    %154 = tpu.matmul %116, %153, %cst_49 {dimension_numbers = #tpu.dot_dimension_numbers<[1], [0], [0], [1], [0, 0, 1, 1], [], []>} : vector<8x32xf32>, vector<32x128xf32>, vector<8x128xf32> -> vector<8x128xf32>
    %155 = arith.addf %152, %154 : vector<8x128xf32>
    %156 = arith.index_cast %150 : i32 to index
    %c128_50 = arith.constant 128 : index
    %157 = vector.load %arg10[%156, %c128_50] : memref<64x256xf32, #tpu.memory_space<vmem>>, vector<8x128xf32>
    %c0_51 = arith.constant 0 : index
    %c0_52 = arith.constant 0 : index
    %158 = vector.load %arg5[%c0_51, %c0_52] : memref<32x128xf32, #tpu.memory_space<vmem>>, vector<32x128xf32>
    %cst_53 = arith.constant dense<0.000000e+00> : vector<8x128xf32>
    %159 = tpu.matmul %141, %158, %cst_53 {dimension_numbers = #tpu.dot_dimension_numbers<[1], [0], [0], [1], [0, 0, 1, 1], [], []>} : vector<8x32xf32>, vector<32x128xf32>, vector<8x128xf32> -> vector<8x128xf32>
    %160 = arith.addf %157, %159 : vector<8x128xf32>
    %161 = vector.extract_strided_slice %155 {offsets = [0, 0], sizes = [8, 32], strides = [1, 1]} : vector<8x128xf32> to vector<8x32xf32>
    %162 = arith.negf %161 : vector<8x32xf32>
    %163 = math.exp %162 : vector<8x32xf32>
    %cst_54 = arith.constant 1.000000e+00 : f32
    %164 = vector.broadcast %cst_54 : f32 to vector<8x32xf32>
    %165 = arith.addf %164, %163 : vector<8x32xf32>
    %166 = arith.divf %164, %165 : vector<8x32xf32>
    %167 = vector.extract_strided_slice %155 {offsets = [0, 32], sizes = [8, 32], strides = [1, 1]} : vector<8x128xf32> to vector<8x32xf32>
    %168 = arith.negf %167 : vector<8x32xf32>
    %169 = math.exp %168 : vector<8x32xf32>
    %cst_55 = arith.constant 1.000000e+00 : f32
    %170 = vector.broadcast %cst_55 : f32 to vector<8x32xf32>
    %171 = arith.addf %170, %169 : vector<8x32xf32>
    %172 = arith.divf %170, %171 : vector<8x32xf32>
    %173 = vector.extract_strided_slice %155 {offsets = [0, 64], sizes = [8, 32], strides = [1, 1]} : vector<8x128xf32> to vector<8x32xf32>
    %174 = math.tanh %173 : vector<8x32xf32>
    %175 = vector.extract_strided_slice %155 {offsets = [0, 96], sizes = [8, 32], strides = [1, 1]} : vector<8x128xf32> to vector<8x32xf32>
    %176 = arith.negf %175 : vector<8x32xf32>
    %177 = math.exp %176 : vector<8x32xf32>
    %cst_56 = arith.constant 1.000000e+00 : f32
    %178 = vector.broadcast %cst_56 : f32 to vector<8x32xf32>
    %179 = arith.addf %178, %177 : vector<8x32xf32>
    %180 = arith.divf %178, %179 : vector<8x32xf32>
    %181 = arith.mulf %172, %114 : vector<8x32xf32>
    %182 = arith.mulf %166, %174 : vector<8x32xf32>
    %183 = arith.addf %181, %182 : vector<8x32xf32>
    %184 = math.tanh %183 : vector<8x32xf32>
    %185 = arith.mulf %180, %184 : vector<8x32xf32>
    %186 = vector.extract_strided_slice %160 {offsets = [0, 0], sizes = [8, 32], strides = [1, 1]} : vector<8x128xf32> to vector<8x32xf32>
    %187 = arith.negf %186 : vector<8x32xf32>
    %188 = math.exp %187 : vector<8x32xf32>
    %cst_57 = arith.constant 1.000000e+00 : f32
    %189 = vector.broadcast %cst_57 : f32 to vector<8x32xf32>
    %190 = arith.addf %189, %188 : vector<8x32xf32>
    %191 = arith.divf %189, %190 : vector<8x32xf32>
    %192 = vector.extract_strided_slice %160 {offsets = [0, 32], sizes = [8, 32], strides = [1, 1]} : vector<8x128xf32> to vector<8x32xf32>
    %193 = arith.negf %192 : vector<8x32xf32>
    %194 = math.exp %193 : vector<8x32xf32>
    %cst_58 = arith.constant 1.000000e+00 : f32
    %195 = vector.broadcast %cst_58 : f32 to vector<8x32xf32>
    %196 = arith.addf %195, %194 : vector<8x32xf32>
    %197 = arith.divf %195, %196 : vector<8x32xf32>
    %198 = vector.extract_strided_slice %160 {offsets = [0, 64], sizes = [8, 32], strides = [1, 1]} : vector<8x128xf32> to vector<8x32xf32>
    %199 = math.tanh %198 : vector<8x32xf32>
    %200 = vector.extract_strided_slice %160 {offsets = [0, 96], sizes = [8, 32], strides = [1, 1]} : vector<8x128xf32> to vector<8x32xf32>
    %201 = arith.negf %200 : vector<8x32xf32>
    %202 = math.exp %201 : vector<8x32xf32>
    %cst_59 = arith.constant 1.000000e+00 : f32
    %203 = vector.broadcast %cst_59 : f32 to vector<8x32xf32>
    %204 = arith.addf %203, %202 : vector<8x32xf32>
    %205 = arith.divf %203, %204 : vector<8x32xf32>
    %206 = arith.mulf %197, %139 : vector<8x32xf32>
    %207 = arith.mulf %191, %199 : vector<8x32xf32>
    %208 = arith.addf %206, %207 : vector<8x32xf32>
    %209 = math.tanh %208 : vector<8x32xf32>
    %210 = arith.mulf %205, %209 : vector<8x32xf32>
    %211 = arith.index_cast %147 : i32 to index
    %c0_60 = arith.constant 0 : index
    %212 = vector.load %arg11[%211, %c0_60] : memref<64x32xf32, #tpu.memory_space<vmem>>, vector<8x32xf32>
    tpu.vector_store %arg11[%211, %c0_60], %185 {strides = array<i32>} : memref<64x32xf32, #tpu.memory_space<vmem>>, vector<8x32xf32>,
    %213 = arith.index_cast %150 : i32 to index
    %c0_61 = arith.constant 0 : index
    %214 = vector.load %arg12[%213, %c0_61] : memref<64x32xf32, #tpu.memory_space<vmem>>, vector<8x32xf32>
    tpu.vector_store %arg12[%213, %c0_61], %210 {strides = array<i32>} : memref<64x32xf32, #tpu.memory_space<vmem>>, vector<8x32xf32>,
    %c3_i32 = arith.constant 3 : i32
    %c8_i32_62 = arith.constant 8 : i32
    %215 = arith.muli %c3_i32, %c8_i32_62 : i32
    %216 = tpu.assume_multiple %215, 8 : i32
    %c7_i32_63 = arith.constant 7 : i32
    %217 = arith.subi %c7_i32_63, %c3_i32 : i32
    %c8_i32_64 = arith.constant 8 : i32
    %218 = arith.muli %217, %c8_i32_64 : i32
    %219 = tpu.assume_multiple %218, 8 : i32
    %220 = arith.index_cast %216 : i32 to index
    %c0_65 = arith.constant 0 : index
    %221 = vector.load %arg10[%220, %c0_65] : memref<64x256xf32, #tpu.memory_space<vmem>>, vector<8x128xf32>
    %c0_66 = arith.constant 0 : index
    %c0_67 = arith.constant 0 : index
    %222 = vector.load %arg4[%c0_66, %c0_67] : memref<32x128xf32, #tpu.memory_space<vmem>>, vector<32x128xf32>
    %cst_68 = arith.constant dense<0.000000e+00> : vector<8x128xf32>
    %223 = tpu.matmul %185, %222, %cst_68 {dimension_numbers = #tpu.dot_dimension_numbers<[1], [0], [0], [1], [0, 0, 1, 1], [], []>} : vector<8x32xf32>, vector<32x128xf32>, vector<8x128xf32> -> vector<8x128xf32>
    %224 = arith.addf %221, %223 : vector<8x128xf32>
    %225 = arith.index_cast %219 : i32 to index
    %c128_69 = arith.constant 128 : index
    %226 = vector.load %arg10[%225, %c128_69] : memref<64x256xf32, #tpu.memory_space<vmem>>, vector<8x128xf32>
    %c0_70 = arith.constant 0 : index
    %c0_71 = arith.constant 0 : index
    %227 = vector.load %arg5[%c0_70, %c0_71] : memref<32x128xf32, #tpu.memory_space<vmem>>, vector<32x128xf32>
    %cst_72 = arith.constant dense<0.000000e+00> : vector<8x128xf32>
    %228 = tpu.matmul %210, %227, %cst_72 {dimension_numbers = #tpu.dot_dimension_numbers<[1], [0], [0], [1], [0, 0, 1, 1], [], []>} : vector<8x32xf32>, vector<32x128xf32>, vector<8x128xf32> -> vector<8x128xf32>
    %229 = arith.addf %226, %228 : vector<8x128xf32>
    %230 = vector.extract_strided_slice %224 {offsets = [0, 0], sizes = [8, 32], strides = [1, 1]} : vector<8x128xf32> to vector<8x32xf32>
    %231 = arith.negf %230 : vector<8x32xf32>
    %232 = math.exp %231 : vector<8x32xf32>
    %cst_73 = arith.constant 1.000000e+00 : f32
    %233 = vector.broadcast %cst_73 : f32 to vector<8x32xf32>
    %234 = arith.addf %233, %232 : vector<8x32xf32>
    %235 = arith.divf %233, %234 : vector<8x32xf32>
    %236 = vector.extract_strided_slice %224 {offsets = [0, 32], sizes = [8, 32], strides = [1, 1]} : vector<8x128xf32> to vector<8x32xf32>
    %237 = arith.negf %236 : vector<8x32xf32>
    %238 = math.exp %237 : vector<8x32xf32>
    %cst_74 = arith.constant 1.000000e+00 : f32
    %239 = vector.broadcast %cst_74 : f32 to vector<8x32xf32>
    %240 = arith.addf %239, %238 : vector<8x32xf32>
    %241 = arith.divf %239, %240 : vector<8x32xf32>
    %242 = vector.extract_strided_slice %224 {offsets = [0, 64], sizes = [8, 32], strides = [1, 1]} : vector<8x128xf32> to vector<8x32xf32>
    %243 = math.tanh %242 : vector<8x32xf32>
    %244 = vector.extract_strided_slice %224 {offsets = [0, 96], sizes = [8, 32], strides = [1, 1]} : vector<8x128xf32> to vector<8x32xf32>
    %245 = arith.negf %244 : vector<8x32xf32>
    %246 = math.exp %245 : vector<8x32xf32>
    %cst_75 = arith.constant 1.000000e+00 : f32
    %247 = vector.broadcast %cst_75 : f32 to vector<8x32xf32>
    %248 = arith.addf %247, %246 : vector<8x32xf32>
    %249 = arith.divf %247, %248 : vector<8x32xf32>
    %250 = arith.mulf %241, %183 : vector<8x32xf32>
    %251 = arith.mulf %235, %243 : vector<8x32xf32>
    %252 = arith.addf %250, %251 : vector<8x32xf32>
    %253 = math.tanh %252 : vector<8x32xf32>
    %254 = arith.mulf %249, %253 : vector<8x32xf32>
    %255 = vector.extract_strided_slice %229 {offsets = [0, 0], sizes = [8, 32], strides = [1, 1]} : vector<8x128xf32> to vector<8x32xf32>
    %256 = arith.negf %255 : vector<8x32xf32>
    %257 = math.exp %256 : vector<8x32xf32>
    %cst_76 = arith.constant 1.000000e+00 : f32
    %258 = vector.broadcast %cst_76 : f32 to vector<8x32xf32>
    %259 = arith.addf %258, %257 : vector<8x32xf32>
    %260 = arith.divf %258, %259 : vector<8x32xf32>
    %261 = vector.extract_strided_slice %229 {offsets = [0, 32], sizes = [8, 32], strides = [1, 1]} : vector<8x128xf32> to vector<8x32xf32>
    %262 = arith.negf %261 : vector<8x32xf32>
    %263 = math.exp %262 : vector<8x32xf32>
    %cst_77 = arith.constant 1.000000e+00 : f32
    %264 = vector.broadcast %cst_77 : f32 to vector<8x32xf32>
    %265 = arith.addf %264, %263 : vector<8x32xf32>
    %266 = arith.divf %264, %265 : vector<8x32xf32>
    %267 = vector.extract_strided_slice %229 {offsets = [0, 64], sizes = [8, 32], strides = [1, 1]} : vector<8x128xf32> to vector<8x32xf32>
    %268 = math.tanh %267 : vector<8x32xf32>
    %269 = vector.extract_strided_slice %229 {offsets = [0, 96], sizes = [8, 32], strides = [1, 1]} : vector<8x128xf32> to vector<8x32xf32>
    %270 = arith.negf %269 : vector<8x32xf32>
    %271 = math.exp %270 : vector<8x32xf32>
    %cst_78 = arith.constant 1.000000e+00 : f32
    %272 = vector.broadcast %cst_78 : f32 to vector<8x32xf32>
    %273 = arith.addf %272, %271 : vector<8x32xf32>
    %274 = arith.divf %272, %273 : vector<8x32xf32>
    %275 = arith.mulf %266, %208 : vector<8x32xf32>
    %276 = arith.mulf %260, %268 : vector<8x32xf32>
    %277 = arith.addf %275, %276 : vector<8x32xf32>
    %278 = math.tanh %277 : vector<8x32xf32>
    %279 = arith.mulf %274, %278 : vector<8x32xf32>
    %280 = arith.index_cast %216 : i32 to index
    %c0_79 = arith.constant 0 : index
    %281 = vector.load %arg11[%280, %c0_79] : memref<64x32xf32, #tpu.memory_space<vmem>>, vector<8x32xf32>
    tpu.vector_store %arg11[%280, %c0_79], %254 {strides = array<i32>} : memref<64x32xf32, #tpu.memory_space<vmem>>, vector<8x32xf32>,
    %282 = arith.index_cast %219 : i32 to index
    %c0_80 = arith.constant 0 : index
    %283 = vector.load %arg12[%282, %c0_80] : memref<64x32xf32, #tpu.memory_space<vmem>>, vector<8x32xf32>
    tpu.vector_store %arg12[%282, %c0_80], %279 {strides = array<i32>} : memref<64x32xf32, #tpu.memory_space<vmem>>, vector<8x32xf32>,
    %c4_i32 = arith.constant 4 : i32
    %c8_i32_81 = arith.constant 8 : i32
    %284 = arith.muli %c4_i32, %c8_i32_81 : i32
    %285 = tpu.assume_multiple %284, 8 : i32
    %c7_i32_82 = arith.constant 7 : i32
    %286 = arith.subi %c7_i32_82, %c4_i32 : i32
    %c8_i32_83 = arith.constant 8 : i32
    %287 = arith.muli %286, %c8_i32_83 : i32
    %288 = tpu.assume_multiple %287, 8 : i32
    %289 = arith.index_cast %285 : i32 to index
    %c0_84 = arith.constant 0 : index
    %290 = vector.load %arg10[%289, %c0_84] : memref<64x256xf32, #tpu.memory_space<vmem>>, vector<8x128xf32>
    %c0_85 = arith.constant 0 : index
    %c0_86 = arith.constant 0 : index
    %291 = vector.load %arg4[%c0_85, %c0_86] : memref<32x128xf32, #tpu.memory_space<vmem>>, vector<32x128xf32>
    %cst_87 = arith.constant dense<0.000000e+00> : vector<8x128xf32>
    %292 = tpu.matmul %254, %291, %cst_87 {dimension_numbers = #tpu.dot_dimension_numbers<[1], [0], [0], [1], [0, 0, 1, 1], [], []>} : vector<8x32xf32>, vector<32x128xf32>, vector<8x128xf32> -> vector<8x128xf32>
    %293 = arith.addf %290, %292 : vector<8x128xf32>
    %294 = arith.index_cast %288 : i32 to index
    %c128_88 = arith.constant 128 : index
    %295 = vector.load %arg10[%294, %c128_88] : memref<64x256xf32, #tpu.memory_space<vmem>>, vector<8x128xf32>
    %c0_89 = arith.constant 0 : index
    %c0_90 = arith.constant 0 : index
    %296 = vector.load %arg5[%c0_89, %c0_90] : memref<32x128xf32, #tpu.memory_space<vmem>>, vector<32x128xf32>
    %cst_91 = arith.constant dense<0.000000e+00> : vector<8x128xf32>
    %297 = tpu.matmul %279, %296, %cst_91 {dimension_numbers = #tpu.dot_dimension_numbers<[1], [0], [0], [1], [0, 0, 1, 1], [], []>} : vector<8x32xf32>, vector<32x128xf32>, vector<8x128xf32> -> vector<8x128xf32>
    %298 = arith.addf %295, %297 : vector<8x128xf32>
    %299 = vector.extract_strided_slice %293 {offsets = [0, 0], sizes = [8, 32], strides = [1, 1]} : vector<8x128xf32> to vector<8x32xf32>
    %300 = arith.negf %299 : vector<8x32xf32>
    %301 = math.exp %300 : vector<8x32xf32>
    %cst_92 = arith.constant 1.000000e+00 : f32
    %302 = vector.broadcast %cst_92 : f32 to vector<8x32xf32>
    %303 = arith.addf %302, %301 : vector<8x32xf32>
    %304 = arith.divf %302, %303 : vector<8x32xf32>
    %305 = vector.extract_strided_slice %293 {offsets = [0, 32], sizes = [8, 32], strides = [1, 1]} : vector<8x128xf32> to vector<8x32xf32>
    %306 = arith.negf %305 : vector<8x32xf32>
    %307 = math.exp %306 : vector<8x32xf32>
    %cst_93 = arith.constant 1.000000e+00 : f32
    %308 = vector.broadcast %cst_93 : f32 to vector<8x32xf32>
    %309 = arith.addf %308, %307 : vector<8x32xf32>
    %310 = arith.divf %308, %309 : vector<8x32xf32>
    %311 = vector.extract_strided_slice %293 {offsets = [0, 64], sizes = [8, 32], strides = [1, 1]} : vector<8x128xf32> to vector<8x32xf32>
    %312 = math.tanh %311 : vector<8x32xf32>
    %313 = vector.extract_strided_slice %293 {offsets = [0, 96], sizes = [8, 32], strides = [1, 1]} : vector<8x128xf32> to vector<8x32xf32>
    %314 = arith.negf %313 : vector<8x32xf32>
    %315 = math.exp %314 : vector<8x32xf32>
    %cst_94 = arith.constant 1.000000e+00 : f32
    %316 = vector.broadcast %cst_94 : f32 to vector<8x32xf32>
    %317 = arith.addf %316, %315 : vector<8x32xf32>
    %318 = arith.divf %316, %317 : vector<8x32xf32>
    %319 = arith.mulf %310, %252 : vector<8x32xf32>
    %320 = arith.mulf %304, %312 : vector<8x32xf32>
    %321 = arith.addf %319, %320 : vector<8x32xf32>
    %322 = math.tanh %321 : vector<8x32xf32>
    %323 = arith.mulf %318, %322 : vector<8x32xf32>
    %324 = vector.extract_strided_slice %298 {offsets = [0, 0], sizes = [8, 32], strides = [1, 1]} : vector<8x128xf32> to vector<8x32xf32>
    %325 = arith.negf %324 : vector<8x32xf32>
    %326 = math.exp %325 : vector<8x32xf32>
    %cst_95 = arith.constant 1.000000e+00 : f32
    %327 = vector.broadcast %cst_95 : f32 to vector<8x32xf32>
    %328 = arith.addf %327, %326 : vector<8x32xf32>
    %329 = arith.divf %327, %328 : vector<8x32xf32>
    %330 = vector.extract_strided_slice %298 {offsets = [0, 32], sizes = [8, 32], strides = [1, 1]} : vector<8x128xf32> to vector<8x32xf32>
    %331 = arith.negf %330 : vector<8x32xf32>
    %332 = math.exp %331 : vector<8x32xf32>
    %cst_96 = arith.constant 1.000000e+00 : f32
    %333 = vector.broadcast %cst_96 : f32 to vector<8x32xf32>
    %334 = arith.addf %333, %332 : vector<8x32xf32>
    %335 = arith.divf %333, %334 : vector<8x32xf32>
    %336 = vector.extract_strided_slice %298 {offsets = [0, 64], sizes = [8, 32], strides = [1, 1]} : vector<8x128xf32> to vector<8x32xf32>
    %337 = math.tanh %336 : vector<8x32xf32>
    %338 = vector.extract_strided_slice %298 {offsets = [0, 96], sizes = [8, 32], strides = [1, 1]} : vector<8x128xf32> to vector<8x32xf32>
    %339 = arith.negf %338 : vector<8x32xf32>
    %340 = math.exp %339 : vector<8x32xf32>
    %cst_97 = arith.constant 1.000000e+00 : f32
    %341 = vector.broadcast %cst_97 : f32 to vector<8x32xf32>
    %342 = arith.addf %341, %340 : vector<8x32xf32>
    %343 = arith.divf %341, %342 : vector<8x32xf32>
    %344 = arith.mulf %335, %277 : vector<8x32xf32>
    %345 = arith.mulf %329, %337 : vector<8x32xf32>
    %346 = arith.addf %344, %345 : vector<8x32xf32>
    %347 = math.tanh %346 : vector<8x32xf32>
    %348 = arith.mulf %343, %347 : vector<8x32xf32>
    %349 = arith.index_cast %285 : i32 to index
    %c0_98 = arith.constant 0 : index
    %350 = vector.load %arg11[%349, %c0_98] : memref<64x32xf32, #tpu.memory_space<vmem>>, vector<8x32xf32>
    tpu.vector_store %arg11[%349, %c0_98], %323 {strides = array<i32>} : memref<64x32xf32, #tpu.memory_space<vmem>>, vector<8x32xf32>,
    %351 = arith.index_cast %288 : i32 to index
    %c0_99 = arith.constant 0 : index
    %352 = vector.load %arg12[%351, %c0_99] : memref<64x32xf32, #tpu.memory_space<vmem>>, vector<8x32xf32>
    tpu.vector_store %arg12[%351, %c0_99], %348 {strides = array<i32>} : memref<64x32xf32, #tpu.memory_space<vmem>>, vector<8x32xf32>,
    %c5_i32 = arith.constant 5 : i32
    %c8_i32_100 = arith.constant 8 : i32
    %353 = arith.muli %c5_i32, %c8_i32_100 : i32
    %354 = tpu.assume_multiple %353, 8 : i32
    %c7_i32_101 = arith.constant 7 : i32
    %355 = arith.subi %c7_i32_101, %c5_i32 : i32
    %c8_i32_102 = arith.constant 8 : i32
    %356 = arith.muli %355, %c8_i32_102 : i32
    %357 = tpu.assume_multiple %356, 8 : i32
    %358 = arith.index_cast %354 : i32 to index
    %c0_103 = arith.constant 0 : index
    %359 = vector.load %arg10[%358, %c0_103] : memref<64x256xf32, #tpu.memory_space<vmem>>, vector<8x128xf32>
    %c0_104 = arith.constant 0 : index
    %c0_105 = arith.constant 0 : index
    %360 = vector.load %arg4[%c0_104, %c0_105] : memref<32x128xf32, #tpu.memory_space<vmem>>, vector<32x128xf32>
    %cst_106 = arith.constant dense<0.000000e+00> : vector<8x128xf32>
    %361 = tpu.matmul %323, %360, %cst_106 {dimension_numbers = #tpu.dot_dimension_numbers<[1], [0], [0], [1], [0, 0, 1, 1], [], []>} : vector<8x32xf32>, vector<32x128xf32>, vector<8x128xf32> -> vector<8x128xf32>
    %362 = arith.addf %359, %361 : vector<8x128xf32>
    %363 = arith.index_cast %357 : i32 to index
    %c128_107 = arith.constant 128 : index
    %364 = vector.load %arg10[%363, %c128_107] : memref<64x256xf32, #tpu.memory_space<vmem>>, vector<8x128xf32>
    %c0_108 = arith.constant 0 : index
    %c0_109 = arith.constant 0 : index
    %365 = vector.load %arg5[%c0_108, %c0_109] : memref<32x128xf32, #tpu.memory_space<vmem>>, vector<32x128xf32>
    %cst_110 = arith.constant dense<0.000000e+00> : vector<8x128xf32>
    %366 = tpu.matmul %348, %365, %cst_110 {dimension_numbers = #tpu.dot_dimension_numbers<[1], [0], [0], [1], [0, 0, 1, 1], [], []>} : vector<8x32xf32>, vector<32x128xf32>, vector<8x128xf32> -> vector<8x128xf32>
    %367 = arith.addf %364, %366 : vector<8x128xf32>
    %368 = vector.extract_strided_slice %362 {offsets = [0, 0], sizes = [8, 32], strides = [1, 1]} : vector<8x128xf32> to vector<8x32xf32>
    %369 = arith.negf %368 : vector<8x32xf32>
    %370 = math.exp %369 : vector<8x32xf32>
    %cst_111 = arith.constant 1.000000e+00 : f32
    %371 = vector.broadcast %cst_111 : f32 to vector<8x32xf32>
    %372 = arith.addf %371, %370 : vector<8x32xf32>
    %373 = arith.divf %371, %372 : vector<8x32xf32>
    %374 = vector.extract_strided_slice %362 {offsets = [0, 32], sizes = [8, 32], strides = [1, 1]} : vector<8x128xf32> to vector<8x32xf32>
    %375 = arith.negf %374 : vector<8x32xf32>
    %376 = math.exp %375 : vector<8x32xf32>
    %cst_112 = arith.constant 1.000000e+00 : f32
    %377 = vector.broadcast %cst_112 : f32 to vector<8x32xf32>
    %378 = arith.addf %377, %376 : vector<8x32xf32>
    %379 = arith.divf %377, %378 : vector<8x32xf32>
    %380 = vector.extract_strided_slice %362 {offsets = [0, 64], sizes = [8, 32], strides = [1, 1]} : vector<8x128xf32> to vector<8x32xf32>
    %381 = math.tanh %380 : vector<8x32xf32>
    %382 = vector.extract_strided_slice %362 {offsets = [0, 96], sizes = [8, 32], strides = [1, 1]} : vector<8x128xf32> to vector<8x32xf32>
    %383 = arith.negf %382 : vector<8x32xf32>
    %384 = math.exp %383 : vector<8x32xf32>
    %cst_113 = arith.constant 1.000000e+00 : f32
    %385 = vector.broadcast %cst_113 : f32 to vector<8x32xf32>
    %386 = arith.addf %385, %384 : vector<8x32xf32>
    %387 = arith.divf %385, %386 : vector<8x32xf32>
    %388 = arith.mulf %379, %321 : vector<8x32xf32>
    %389 = arith.mulf %373, %381 : vector<8x32xf32>
    %390 = arith.addf %388, %389 : vector<8x32xf32>
    %391 = math.tanh %390 : vector<8x32xf32>
    %392 = arith.mulf %387, %391 : vector<8x32xf32>
    %393 = vector.extract_strided_slice %367 {offsets = [0, 0], sizes = [8, 32], strides = [1, 1]} : vector<8x128xf32> to vector<8x32xf32>
    %394 = arith.negf %393 : vector<8x32xf32>
    %395 = math.exp %394 : vector<8x32xf32>
    %cst_114 = arith.constant 1.000000e+00 : f32
    %396 = vector.broadcast %cst_114 : f32 to vector<8x32xf32>
    %397 = arith.addf %396, %395 : vector<8x32xf32>
    %398 = arith.divf %396, %397 : vector<8x32xf32>
    %399 = vector.extract_strided_slice %367 {offsets = [0, 32], sizes = [8, 32], strides = [1, 1]} : vector<8x128xf32> to vector<8x32xf32>
    %400 = arith.negf %399 : vector<8x32xf32>
    %401 = math.exp %400 : vector<8x32xf32>
    %cst_115 = arith.constant 1.000000e+00 : f32
    %402 = vector.broadcast %cst_115 : f32 to vector<8x32xf32>
    %403 = arith.addf %402, %401 : vector<8x32xf32>
    %404 = arith.divf %402, %403 : vector<8x32xf32>
    %405 = vector.extract_strided_slice %367 {offsets = [0, 64], sizes = [8, 32], strides = [1, 1]} : vector<8x128xf32> to vector<8x32xf32>
    %406 = math.tanh %405 : vector<8x32xf32>
    %407 = vector.extract_strided_slice %367 {offsets = [0, 96], sizes = [8, 32], strides = [1, 1]} : vector<8x128xf32> to vector<8x32xf32>
    %408 = arith.negf %407 : vector<8x32xf32>
    %409 = math.exp %408 : vector<8x32xf32>
    %cst_116 = arith.constant 1.000000e+00 : f32
    %410 = vector.broadcast %cst_116 : f32 to vector<8x32xf32>
    %411 = arith.addf %410, %409 : vector<8x32xf32>
    %412 = arith.divf %410, %411 : vector<8x32xf32>
    %413 = arith.mulf %404, %346 : vector<8x32xf32>
    %414 = arith.mulf %398, %406 : vector<8x32xf32>
    %415 = arith.addf %413, %414 : vector<8x32xf32>
    %416 = math.tanh %415 : vector<8x32xf32>
    %417 = arith.mulf %412, %416 : vector<8x32xf32>
    %418 = arith.index_cast %354 : i32 to index
    %c0_117 = arith.constant 0 : index
    %419 = vector.load %arg11[%418, %c0_117] : memref<64x32xf32, #tpu.memory_space<vmem>>, vector<8x32xf32>
    tpu.vector_store %arg11[%418, %c0_117], %392 {strides = array<i32>} : memref<64x32xf32, #tpu.memory_space<vmem>>, vector<8x32xf32>,
    %420 = arith.index_cast %357 : i32 to index
    %c0_118 = arith.constant 0 : index
    %421 = vector.load %arg12[%420, %c0_118] : memref<64x32xf32, #tpu.memory_space<vmem>>, vector<8x32xf32>
    tpu.vector_store %arg12[%420, %c0_118], %417 {strides = array<i32>} : memref<64x32xf32, #tpu.memory_space<vmem>>, vector<8x32xf32>,
    %c6_i32 = arith.constant 6 : i32
    %c8_i32_119 = arith.constant 8 : i32
    %422 = arith.muli %c6_i32, %c8_i32_119 : i32
    %423 = tpu.assume_multiple %422, 8 : i32
    %c7_i32_120 = arith.constant 7 : i32
    %424 = arith.subi %c7_i32_120, %c6_i32 : i32
    %c8_i32_121 = arith.constant 8 : i32
    %425 = arith.muli %424, %c8_i32_121 : i32
    %426 = tpu.assume_multiple %425, 8 : i32
    %427 = arith.index_cast %423 : i32 to index
    %c0_122 = arith.constant 0 : index
    %428 = vector.load %arg10[%427, %c0_122] : memref<64x256xf32, #tpu.memory_space<vmem>>, vector<8x128xf32>
    %c0_123 = arith.constant 0 : index
    %c0_124 = arith.constant 0 : index
    %429 = vector.load %arg4[%c0_123, %c0_124] : memref<32x128xf32, #tpu.memory_space<vmem>>, vector<32x128xf32>
    %cst_125 = arith.constant dense<0.000000e+00> : vector<8x128xf32>
    %430 = tpu.matmul %392, %429, %cst_125 {dimension_numbers = #tpu.dot_dimension_numbers<[1], [0], [0], [1], [0, 0, 1, 1], [], []>} : vector<8x32xf32>, vector<32x128xf32>, vector<8x128xf32> -> vector<8x128xf32>
    %431 = arith.addf %428, %430 : vector<8x128xf32>
    %432 = arith.index_cast %426 : i32 to index
    %c128_126 = arith.constant 128 : index
    %433 = vector.load %arg10[%432, %c128_126] : memref<64x256xf32, #tpu.memory_space<vmem>>, vector<8x128xf32>
    %c0_127 = arith.constant 0 : index
    %c0_128 = arith.constant 0 : index
    %434 = vector.load %arg5[%c0_127, %c0_128] : memref<32x128xf32, #tpu.memory_space<vmem>>, vector<32x128xf32>
    %cst_129 = arith.constant dense<0.000000e+00> : vector<8x128xf32>
    %435 = tpu.matmul %417, %434, %cst_129 {dimension_numbers = #tpu.dot_dimension_numbers<[1], [0], [0], [1], [0, 0, 1, 1], [], []>} : vector<8x32xf32>, vector<32x128xf32>, vector<8x128xf32> -> vector<8x128xf32>
    %436 = arith.addf %433, %435 : vector<8x128xf32>
    %437 = vector.extract_strided_slice %431 {offsets = [0, 0], sizes = [8, 32], strides = [1, 1]} : vector<8x128xf32> to vector<8x32xf32>
    %438 = arith.negf %437 : vector<8x32xf32>
    %439 = math.exp %438 : vector<8x32xf32>
    %cst_130 = arith.constant 1.000000e+00 : f32
    %440 = vector.broadcast %cst_130 : f32 to vector<8x32xf32>
    %441 = arith.addf %440, %439 : vector<8x32xf32>
    %442 = arith.divf %440, %441 : vector<8x32xf32>
    %443 = vector.extract_strided_slice %431 {offsets = [0, 32], sizes = [8, 32], strides = [1, 1]} : vector<8x128xf32> to vector<8x32xf32>
    %444 = arith.negf %443 : vector<8x32xf32>
    %445 = math.exp %444 : vector<8x32xf32>
    %cst_131 = arith.constant 1.000000e+00 : f32
    %446 = vector.broadcast %cst_131 : f32 to vector<8x32xf32>
    %447 = arith.addf %446, %445 : vector<8x32xf32>
    %448 = arith.divf %446, %447 : vector<8x32xf32>
    %449 = vector.extract_strided_slice %431 {offsets = [0, 64], sizes = [8, 32], strides = [1, 1]} : vector<8x128xf32> to vector<8x32xf32>
    %450 = math.tanh %449 : vector<8x32xf32>
    %451 = vector.extract_strided_slice %431 {offsets = [0, 96], sizes = [8, 32], strides = [1, 1]} : vector<8x128xf32> to vector<8x32xf32>
    %452 = arith.negf %451 : vector<8x32xf32>
    %453 = math.exp %452 : vector<8x32xf32>
    %cst_132 = arith.constant 1.000000e+00 : f32
    %454 = vector.broadcast %cst_132 : f32 to vector<8x32xf32>
    %455 = arith.addf %454, %453 : vector<8x32xf32>
    %456 = arith.divf %454, %455 : vector<8x32xf32>
    %457 = arith.mulf %448, %390 : vector<8x32xf32>
    %458 = arith.mulf %442, %450 : vector<8x32xf32>
    %459 = arith.addf %457, %458 : vector<8x32xf32>
    %460 = math.tanh %459 : vector<8x32xf32>
    %461 = arith.mulf %456, %460 : vector<8x32xf32>
    %462 = vector.extract_strided_slice %436 {offsets = [0, 0], sizes = [8, 32], strides = [1, 1]} : vector<8x128xf32> to vector<8x32xf32>
    %463 = arith.negf %462 : vector<8x32xf32>
    %464 = math.exp %463 : vector<8x32xf32>
    %cst_133 = arith.constant 1.000000e+00 : f32
    %465 = vector.broadcast %cst_133 : f32 to vector<8x32xf32>
    %466 = arith.addf %465, %464 : vector<8x32xf32>
    %467 = arith.divf %465, %466 : vector<8x32xf32>
    %468 = vector.extract_strided_slice %436 {offsets = [0, 32], sizes = [8, 32], strides = [1, 1]} : vector<8x128xf32> to vector<8x32xf32>
    %469 = arith.negf %468 : vector<8x32xf32>
    %470 = math.exp %469 : vector<8x32xf32>
    %cst_134 = arith.constant 1.000000e+00 : f32
    %471 = vector.broadcast %cst_134 : f32 to vector<8x32xf32>
    %472 = arith.addf %471, %470 : vector<8x32xf32>
    %473 = arith.divf %471, %472 : vector<8x32xf32>
    %474 = vector.extract_strided_slice %436 {offsets = [0, 64], sizes = [8, 32], strides = [1, 1]} : vector<8x128xf32> to vector<8x32xf32>
    %475 = math.tanh %474 : vector<8x32xf32>
    %476 = vector.extract_strided_slice %436 {offsets = [0, 96], sizes = [8, 32], strides = [1, 1]} : vector<8x128xf32> to vector<8x32xf32>
    %477 = arith.negf %476 : vector<8x32xf32>
    %478 = math.exp %477 : vector<8x32xf32>
    %cst_135 = arith.constant 1.000000e+00 : f32
    %479 = vector.broadcast %cst_135 : f32 to vector<8x32xf32>
    %480 = arith.addf %479, %478 : vector<8x32xf32>
    %481 = arith.divf %479, %480 : vector<8x32xf32>
    %482 = arith.mulf %473, %415 : vector<8x32xf32>
    %483 = arith.mulf %467, %475 : vector<8x32xf32>
    %484 = arith.addf %482, %483 : vector<8x32xf32>
    %485 = math.tanh %484 : vector<8x32xf32>
    %486 = arith.mulf %481, %485 : vector<8x32xf32>
    %487 = arith.index_cast %423 : i32 to index
    %c0_136 = arith.constant 0 : index
    %488 = vector.load %arg11[%487, %c0_136] : memref<64x32xf32, #tpu.memory_space<vmem>>, vector<8x32xf32>
    tpu.vector_store %arg11[%487, %c0_136], %461 {strides = array<i32>} : memref<64x32xf32, #tpu.memory_space<vmem>>, vector<8x32xf32>,
    %489 = arith.index_cast %426 : i32 to index
    %c0_137 = arith.constant 0 : index
    %490 = vector.load %arg12[%489, %c0_137] : memref<64x32xf32, #tpu.memory_space<vmem>>, vector<8x32xf32>
    tpu.vector_store %arg12[%489, %c0_137], %486 {strides = array<i32>} : memref<64x32xf32, #tpu.memory_space<vmem>>, vector<8x32xf32>,
    %c7_i32_138 = arith.constant 7 : i32
    %c8_i32_139 = arith.constant 8 : i32
    %491 = arith.muli %c7_i32_138, %c8_i32_139 : i32
    %492 = tpu.assume_multiple %491, 8 : i32
    %c7_i32_140 = arith.constant 7 : i32
    %493 = arith.subi %c7_i32_140, %c7_i32_138 : i32
    %c8_i32_141 = arith.constant 8 : i32
    %494 = arith.muli %493, %c8_i32_141 : i32
    %495 = tpu.assume_multiple %494, 8 : i32
    %496 = arith.index_cast %492 : i32 to index
    %c0_142 = arith.constant 0 : index
    %497 = vector.load %arg10[%496, %c0_142] : memref<64x256xf32, #tpu.memory_space<vmem>>, vector<8x128xf32>
    %c0_143 = arith.constant 0 : index
    %c0_144 = arith.constant 0 : index
    %498 = vector.load %arg4[%c0_143, %c0_144] : memref<32x128xf32, #tpu.memory_space<vmem>>, vector<32x128xf32>
    %cst_145 = arith.constant dense<0.000000e+00> : vector<8x128xf32>
    %499 = tpu.matmul %461, %498, %cst_145 {dimension_numbers = #tpu.dot_dimension_numbers<[1], [0], [0], [1], [0, 0, 1, 1], [], []>} : vector<8x32xf32>, vector<32x128xf32>, vector<8x128xf32> -> vector<8x128xf32>
    %500 = arith.addf %497, %499 : vector<8x128xf32>
    %501 = arith.index_cast %495 : i32 to index
    %c128_146 = arith.constant 128 : index
    %502 = vector.load %arg10[%501, %c128_146] : memref<64x256xf32, #tpu.memory_space<vmem>>, vector<8x128xf32>
    %c0_147 = arith.constant 0 : index
    %c0_148 = arith.constant 0 : index
    %503 = vector.load %arg5[%c0_147, %c0_148] : memref<32x128xf32, #tpu.memory_space<vmem>>, vector<32x128xf32>
    %cst_149 = arith.constant dense<0.000000e+00> : vector<8x128xf32>
    %504 = tpu.matmul %486, %503, %cst_149 {dimension_numbers = #tpu.dot_dimension_numbers<[1], [0], [0], [1], [0, 0, 1, 1], [], []>} : vector<8x32xf32>, vector<32x128xf32>, vector<8x128xf32> -> vector<8x128xf32>
    %505 = arith.addf %502, %504 : vector<8x128xf32>
    %506 = vector.extract_strided_slice %500 {offsets = [0, 0], sizes = [8, 32], strides = [1, 1]} : vector<8x128xf32> to vector<8x32xf32>
    %507 = arith.negf %506 : vector<8x32xf32>
    %508 = math.exp %507 : vector<8x32xf32>
    %cst_150 = arith.constant 1.000000e+00 : f32
    %509 = vector.broadcast %cst_150 : f32 to vector<8x32xf32>
    %510 = arith.addf %509, %508 : vector<8x32xf32>
    %511 = arith.divf %509, %510 : vector<8x32xf32>
    %512 = vector.extract_strided_slice %500 {offsets = [0, 32], sizes = [8, 32], strides = [1, 1]} : vector<8x128xf32> to vector<8x32xf32>
    %513 = arith.negf %512 : vector<8x32xf32>
    %514 = math.exp %513 : vector<8x32xf32>
    %cst_151 = arith.constant 1.000000e+00 : f32
    %515 = vector.broadcast %cst_151 : f32 to vector<8x32xf32>
    %516 = arith.addf %515, %514 : vector<8x32xf32>
    %517 = arith.divf %515, %516 : vector<8x32xf32>
    %518 = vector.extract_strided_slice %500 {offsets = [0, 64], sizes = [8, 32], strides = [1, 1]} : vector<8x128xf32> to vector<8x32xf32>
    %519 = math.tanh %518 : vector<8x32xf32>
    %520 = vector.extract_strided_slice %500 {offsets = [0, 96], sizes = [8, 32], strides = [1, 1]} : vector<8x128xf32> to vector<8x32xf32>
    %521 = arith.negf %520 : vector<8x32xf32>
    %522 = math.exp %521 : vector<8x32xf32>
    %cst_152 = arith.constant 1.000000e+00 : f32
    %523 = vector.broadcast %cst_152 : f32 to vector<8x32xf32>
    %524 = arith.addf %523, %522 : vector<8x32xf32>
    %525 = arith.divf %523, %524 : vector<8x32xf32>
    %526 = arith.mulf %517, %459 : vector<8x32xf32>
    %527 = arith.mulf %511, %519 : vector<8x32xf32>
    %528 = arith.addf %526, %527 : vector<8x32xf32>
    %529 = math.tanh %528 : vector<8x32xf32>
    %530 = arith.mulf %525, %529 : vector<8x32xf32>
    %531 = vector.extract_strided_slice %505 {offsets = [0, 0], sizes = [8, 32], strides = [1, 1]} : vector<8x128xf32> to vector<8x32xf32>
    %532 = arith.negf %531 : vector<8x32xf32>
    %533 = math.exp %532 : vector<8x32xf32>
    %cst_153 = arith.constant 1.000000e+00 : f32
    %534 = vector.broadcast %cst_153 : f32 to vector<8x32xf32>
    %535 = arith.addf %534, %533 : vector<8x32xf32>
    %536 = arith.divf %534, %535 : vector<8x32xf32>
    %537 = vector.extract_strided_slice %505 {offsets = [0, 32], sizes = [8, 32], strides = [1, 1]} : vector<8x128xf32> to vector<8x32xf32>
    %538 = arith.negf %537 : vector<8x32xf32>
    %539 = math.exp %538 : vector<8x32xf32>
    %cst_154 = arith.constant 1.000000e+00 : f32
    %540 = vector.broadcast %cst_154 : f32 to vector<8x32xf32>
    %541 = arith.addf %540, %539 : vector<8x32xf32>
    %542 = arith.divf %540, %541 : vector<8x32xf32>
    %543 = vector.extract_strided_slice %505 {offsets = [0, 64], sizes = [8, 32], strides = [1, 1]} : vector<8x128xf32> to vector<8x32xf32>
    %544 = math.tanh %543 : vector<8x32xf32>
    %545 = vector.extract_strided_slice %505 {offsets = [0, 96], sizes = [8, 32], strides = [1, 1]} : vector<8x128xf32> to vector<8x32xf32>
    %546 = arith.negf %545 : vector<8x32xf32>
    %547 = math.exp %546 : vector<8x32xf32>
    %cst_155 = arith.constant 1.000000e+00 : f32
    %548 = vector.broadcast %cst_155 : f32 to vector<8x32xf32>
    %549 = arith.addf %548, %547 : vector<8x32xf32>
    %550 = arith.divf %548, %549 : vector<8x32xf32>
    %551 = arith.mulf %542, %484 : vector<8x32xf32>
    %552 = arith.mulf %536, %544 : vector<8x32xf32>
    %553 = arith.addf %551, %552 : vector<8x32xf32>
    %554 = math.tanh %553 : vector<8x32xf32>
    %555 = arith.mulf %550, %554 : vector<8x32xf32>
    %556 = arith.index_cast %492 : i32 to index
    %c0_156 = arith.constant 0 : index
    %557 = vector.load %arg11[%556, %c0_156] : memref<64x32xf32, #tpu.memory_space<vmem>>, vector<8x32xf32>
    tpu.vector_store %arg11[%556, %c0_156], %530 {strides = array<i32>} : memref<64x32xf32, #tpu.memory_space<vmem>>, vector<8x32xf32>,
    %558 = arith.index_cast %495 : i32 to index
    %c0_157 = arith.constant 0 : index
    %559 = vector.load %arg12[%558, %c0_157] : memref<64x32xf32, #tpu.memory_space<vmem>>, vector<8x32xf32>
    tpu.vector_store %arg12[%558, %c0_157], %555 {strides = array<i32>} : memref<64x32xf32, #tpu.memory_space<vmem>>, vector<8x32xf32>,
    %c8_i32_158 = arith.constant 8 : i32
    %c0_159 = arith.constant 0 : index
    %c0_160 = arith.constant 0 : index
    %560 = vector.load %arg11[%c0_159, %c0_160] : memref<64x32xf32, #tpu.memory_space<vmem>>, vector<64x32xf32>
    %c0_161 = arith.constant 0 : index
    %c0_162 = arith.constant 0 : index
    %561 = vector.load %arg6[%c0_161, %c0_162] : memref<32x128xf32, #tpu.memory_space<vmem>>, vector<32x128xf32>
    %cst_163 = arith.constant dense<0.000000e+00> : vector<64x128xf32>
    %562 = tpu.matmul %560, %561, %cst_163 {dimension_numbers = #tpu.dot_dimension_numbers<[1], [0], [0], [1], [0, 0, 1, 1], [], []>} : vector<64x32xf32>, vector<32x128xf32>, vector<64x128xf32> -> vector<64x128xf32>
    %c0_164 = arith.constant 0 : index
    %c0_165 = arith.constant 0 : index
    %563 = vector.load %arg12[%c0_164, %c0_165] : memref<64x32xf32, #tpu.memory_space<vmem>>, vector<64x32xf32>
    %c0_166 = arith.constant 0 : index
    %c0_167 = arith.constant 0 : index
    %564 = vector.load %arg7[%c0_166, %c0_167] : memref<32x128xf32, #tpu.memory_space<vmem>>, vector<32x128xf32>
    %cst_168 = arith.constant dense<0.000000e+00> : vector<64x128xf32>
    %565 = tpu.matmul %563, %564, %cst_168 {dimension_numbers = #tpu.dot_dimension_numbers<[1], [0], [0], [1], [0, 0, 1, 1], [], []>} : vector<64x32xf32>, vector<32x128xf32>, vector<64x128xf32> -> vector<64x128xf32>
    %566 = arith.addf %562, %565 : vector<64x128xf32>
    %c0_169 = arith.constant 0 : index
    %c0_170 = arith.constant 0 : index
    %567 = vector.load %arg8[%c0_169, %c0_170] : memref<1x128xf32, #tpu.memory_space<vmem>>, vector<1x128xf32>
    %568 = vector.broadcast %567 : vector<1x128xf32> to vector<64x128xf32>
    %569 = arith.addf %566, %568 : vector<64x128xf32>
    %c0_171 = arith.constant 0 : index
    %c0_172 = arith.constant 0 : index
    %570 = vector.load %arg9[%c0_171, %c0_172] : memref<64x128xf32, #tpu.memory_space<vmem>>, vector<64x128xf32>
    tpu.vector_store %arg9[%c0_171, %c0_172], %569 {strides = array<i32>} : memref<64x128xf32, #tpu.memory_space<vmem>>, vector<64x128xf32>,
    return
  }
  func.func @transform_0(%arg0: i32) -> (i32, i32) {
    %c0_i32 = arith.constant 0 : i32
    %c0_i32_0 = arith.constant 0 : i32
    %c0_i32_1 = arith.constant 0 : i32
    return %c0_i32, %c0_i32_0 : i32, i32
  }
  func.func @transform_1(%arg0: i32) -> (i32, i32) {
    %c0_i32 = arith.constant 0 : i32
    %c0_i32_0 = arith.constant 0 : i32
    %c0_i32_1 = arith.constant 0 : i32
    return %c0_i32, %c0_i32_0 : i32, i32
  }
  func.func @transform_2(%arg0: i32) -> (i32, i32) {
    %c0_i32 = arith.constant 0 : i32
    %c0_i32_0 = arith.constant 0 : i32
    %c0_i32_1 = arith.constant 0 : i32
    return %c0_i32, %c0_i32_0 : i32, i32
  }
  func.func @transform_3(%arg0: i32) -> (i32, i32) {
    %c0_i32 = arith.constant 0 : i32
    %c0_i32_0 = arith.constant 0 : i32
    %c0_i32_1 = arith.constant 0 : i32
    return %c0_i32, %c0_i32_0 : i32, i32
  }
  func.func @transform_4(%arg0: i32) -> (i32, i32) {
    %c0_i32 = arith.constant 0 : i32
    %c0_i32_0 = arith.constant 0 : i32
    %c0_i32_1 = arith.constant 0 : i32
    return %c0_i32, %c0_i32_0 : i32, i32
  }
  func.func @transform_5(%arg0: i32) -> (i32, i32) {
    %c0_i32 = arith.constant 0 : i32
    %c0_i32_0 = arith.constant 0 : i32
    %c0_i32_1 = arith.constant 0 : i32
    return %c0_i32, %c0_i32_0 : i32, i32
  }
  func.func @transform_6(%arg0: i32) -> (i32, i32) {
    %c0_i32 = arith.constant 0 : i32
    %c0_i32_0 = arith.constant 0 : i32
    %c0_i32_1 = arith.constant 0 : i32
    return %c0_i32, %c0_i32_0 : i32, i32
  }
  func.func @transform_7(%arg0: i32) -> (i32, i32) {
    %c0_i32 = arith.constant 0 : i32
    %c0_i32_0 = arith.constant 0 : i32
    %c0_i32_1 = arith.constant 0 : i32
    return %c0_i32, %c0_i32_0 : i32, i32
  }
  func.func @transform_8(%arg0: i32) -> (i32, i32) {
    %c0_i32 = arith.constant 0 : i32
    %c0_i32_0 = arith.constant 0 : i32
    %c0_i32_1 = arith.constant 0 : i32
    return %c0_i32, %c0_i32_0 : i32, i32
  }
}

</mosaic_0001>

<bundles_post_ra>
// kernel: tpu_custom_call.1
= control target key start
LH: loop header
LB: loop body
LE: loop exit
PB: predicated region body
PF: predicated region fallthrough
CT: control target
= control target key end

     0   :  { %13 = vsyncpa [#allocation6], 0  ;;  %s3537_s0 = inlined_call_operand.vmem [shape: f32[64,16], index: 0, kind: input, shape index: {}]   ;;  %s3538_s1 = inlined_call_operand.vmem [shape: f32[16,256], index: 1, kind: input, shape index: {}]   ;;  %s3539_s2 = inlined_call_operand.vmem [shape: f32[1,256], index: 2, kind: input, shape index: {}]   ;;  %s3540_s3 = inlined_call_operand.vmem [shape: f32[32,128], index: 3, kind: input, shape index: {}]   ;;  %s3541_s4 = inlined_call_operand.hbm [shape: f32[32,128], index: 4, kind: input, shape index: {}]   ;;  %s3542_s5 = inlined_call_operand.vmem [shape: f32[32,128], index: 5, kind: input, shape index: {}]   ;;  %s3543_s6 = inlined_call_operand.hbm [shape: f32[32,128], index: 6, kind: input, shape index: {}]   ;;  %s3544_s7 = inlined_call_operand.vmem [shape: f32[1,128], index: 7, kind: input, shape index: {}]   ;;  %s3545_s8 = inlined_call_operand.hbm [shape: f32[64,128], index: 8, kind: output, shape index: {}]  }
   0x1   :  { %14 = vsyncpa [#allocation9], 0 }
   0x2   :  { %15 = vsyncpa [#allocation7], 0  ;;  %s3027_s27 = smov [#allocation5]   ;;  %s2955_s9 = scalar_lea.hbm %s3541_s4, 512 }
   0x3   :  { %s29_s28 = sshll.u32 %s3027_s27, 4  ;;  %p2956_p0 = scmp.ne.s32.totalorder %s3541_s4, %s2955_s9  ;;  %s30_s28 = int_to_ptr.vmem [resolvable:$true] %s29_s28 }
   0x4   :  { %p2959_p1 = scmp.lt.u32.totalorder %s2955_s9, %s3541_s4 }
   0x6   :  { %p2961_p2 = pnand %p2959_p1, %p2956_p0 }
   0x8   :  { %2964 = shalt.err (!%p2961_p2)
}
   0x9   :  { %s2965_s14 = scalar_lea.vmem %s30_s28, 512  ;;  %p2970_p4 = scmp.lt.s32.totalorder %s30_s28, %s30_s28 }
   0xa   :  { %p2966_p3 = scmp.ne.s32.totalorder %s30_s28, %s2965_s14  ;;  %p2971_p5 = scmp.lt.s32.totalorder %s2965_s14, %s2965_s14 }
   0xc   :  { %p2972_p6 = por %p2971_p5, %p2970_p4 }
   0xe   :  { %p2973_p7 = pnand %p2972_p6, %p2966_p3 }
  0x10   :  { %2976 = shalt.err (!%p2973_p7)
}
  0x11   :  { %s3028_s15 = smov 128   ;;  %s3029_s16 = smov 8  }
  0x12   :  { %35 = dma.hbm_to_vmem [thread:$0]  %s3541_s4, 512, %s30_s28, [#allocation6], %s3028_s15, %s3028_s15, %s3029_s16  }
  0x13   :  { %s3030_s19 = smov [#allocation8]   ;;  %s2977_s23 = scalar_lea.hbm %s3543_s6, 512 }
  0x14   :  { %s43_s20 = sshll.u32 %s3030_s19, 4  ;;  %p2978_p8 = scmp.ne.s32.totalorder %s3543_s6, %s2977_s23  ;;  %s44_s20 = int_to_ptr.vmem [resolvable:$true] %s43_s20 }
  0x15   :  { %p2981_p9 = scmp.lt.u32.totalorder %s2977_s23, %s3543_s6 }
  0x17   :  { %p2983_p10 = pnand %p2981_p9, %p2978_p8 }
  0x19   :  { %2986 = shalt.err (!%p2983_p10)
}
  0x1a   :  { %s2987_s29 = scalar_lea.vmem %s44_s20, 512  ;;  %p2992_p12 = scmp.lt.s32.totalorder %s44_s20, %s44_s20 }
  0x1b   :  { %p2988_p11 = scmp.ne.s32.totalorder %s44_s20, %s2987_s29  ;;  %p2993_p13 = scmp.lt.s32.totalorder %s2987_s29, %s2987_s29 }
  0x1d   :  { %p2994_p0 = por %p2993_p13, %p2992_p12 }
  0x1f   :  { %p2995_p1 = pnand %p2994_p0, %p2988_p11 }
  0x21   :  { %2998 = shalt.err (!%p2995_p1)
}
  0x22   :  { %49 = dma.hbm_to_vmem [thread:$0]  %s3543_s6, 512, %s44_s20, [#allocation9], %s3028_s15, %s3028_s15, %s3029_s16  }
  0x23   :  { %3021 = dma.done.wait [#allocation6], 512  }
  0x24   :  { %3022 = vsyncadd [#allocation6], 4294966784 }
  0x25   :  { %3023 = dma.done.wait [#allocation9], 512  }
  0x26   :  { %3024 = vsyncadd [#allocation9], 4294966784  ;;  %v3031_v0 = vmov 0.0   ;;  %v67_v1 = vld [vmem:[%s3538_s1 + $0x8] sm:$0xff]  ;;  %v69_v2 = vld [vmem:[%s3538_s1 + $0x18] sm:$0xff]  ;;  %vm82_vm0 = vcmask 130048   ;;  %v72_v25 = vlaneseq }
  0x27   :  { %195 = vmatprep.mubr.f32.mxu1 %v3031_v0  ;;  %171 = vmatprep.mubr.f32.mxu0 %v3031_v0  ;;  %v66_v3 = vld [vmem:[%s3538_s1] sm:$0xff]  ;;  %v2691_v4 = vpack.c.bf16 %v69_v2, %v67_v1  ;;  %v68_v5 = vld [vmem:[%s3538_s1 + $0x10] sm:$0xff]  ;;  %v241_v8 = vld [vmem:[%s3540_s3 + $0x8] sm:$0xff]  ;;  %v3032_v12 = vmov 0.0|0.0   ;;  %vm3033_vm1 = vmmov 0   ;;  %s3035_s13 = smov 32  }
  0x28   :  { %v240_v6 = vld [vmem:[%s3540_s3] sm:$0xff]  ;;  %v2693_v7 = vpack.c.bf16 %v68_v5, %v66_v3  ;;  %v242_v13 = vld [vmem:[%s3540_s3 + $0x10] sm:$0xff]  ;;  %v243_v14 = vld [vmem:[%s3540_s3 + $0x18] sm:$0xff]  ;;  %v73_v30 = vshrl.u32 %v72_v25, 7  ;;  %vm244_vm2 = vcmask 261120   ;;  %s3036_s12 = smov [#allocation10]  }
  0x29   :  { %2807 = vmatprep.subr.bf16.mxu1 %v2691_v4  ;;  %2692 = vmatprep.subr.bf16.mxu0 %v2691_v4  ;;  %v62_v9 = vld [vmem:[%s3537_s0 + $0x20] sm:$0xff]  ;;  %v3135_v10 = vpack.c.bf16 %v241_v8, %v240_v6  ;;  %v63_v15 = vld [vmem:[%s3537_s0 + $0x28] sm:$0xff]  ;;  %v3155_v16 = vpack.c.bf16 %v243_v14, %v242_v13  ;;  %v64_v17 = vld [vmem:[%s3537_s0 + $0x30] sm:$0xff] }
  0x2a   :  { %2808 = vmatpush1.bf16.msra.mxu1 %v2693_v7  ;;  %2694 = vmatpush1.bf16.msra.mxu0 %v2693_v7  ;;  %v58_v11 = vld [vmem:[%s3537_s0] sm:$0xff]  ;;  %v65_v18 = vld [vmem:[%s3537_s0 + $0x38] sm:$0xff]  ;;  %v324_v20 = vld [vmem:[#allocation5 + $0x8] sm:$0xff]  ;;  %v74_v33 = vsub.s32 0, %v73_v30  ;;  %v78_v42 = vsub.s32 1, %v73_v30 }
  0x2b   :  { %2695 = vmatprep.subr.bf16.mxu1 %v3032_v12  ;;  %2719 = vmatprep.subr.bf16.mxu0 %v3032_v12  ;;  %v323_v19 = vld [vmem:[#allocation5] sm:$0xff]  ;;  %v325_v22 = vld [vmem:[#allocation5 + $0x10] sm:$0xff]  ;;  %v326_v23 = vld [vmem:[#allocation5 + $0x18] sm:$0xff] }
  0x2c   :  { %v3178_v21 = vpack.c.bf16 %v324_v20, %v323_v19  ;;  %v3182_v24 = vpack.c.bf16 %v326_v23, %v325_v22  ;;  %v70_v34 = vld [vmem:[%s3539_s2] sm:$0x3]  ;;  %s3034_s2 = smov 64   ;;  %v59_v7 = vld [vmem:[%s3537_s0 + $0x8] sm:$0xff] }
  0x2d   :  { %2320 = vmatmul.mubr.msk.f32.vlgmr.msra.gmra.mrb[0].mxu1 %vm82_vm0, %v62_v9  ;;  %2316 = vmatmul.mubr.msk.f32.vlgmr.msra.gmra.mrb[0].mxu0 %vm82_vm0, %v58_v11  ;;  %v3213_v37 = vrot.slane %v70_v34, %v74_v33  ;;  %v3218_v45 = vrot.slane %v70_v34, %v78_v42 }
  0x2e   :  { %2697 = vmatpush3.bf16.msra.mxu1 %v3135_v10  ;;  %201 = vmatprep.mubr.f32.mxu1 %v3031_v0 }
  0x2f   :  { %2698 = vmatprep.subr.bf16.mxu1 %v3032_v12  ;;  %177 = vmatprep.mubr.f32.mxu0 %v3031_v0 }
  0x30   :  { %2721 = vmatpush3.bf16.msra.mxu0 %v3135_v10 }
  0x31   :  { %2321 = vmatmul.mubr.msk.f32.gmra.mrb[2].mxu1 %vm82_vm0, %v63_v15  ;;  %2722 = vmatprep.subr.bf16.mxu0 %v3032_v12 }
  0x32   :  { %207 = vmatprep.mubr.f32.mxu1 %v3031_v0  ;;  %2700 = vmatpush3.bf16.msra.mxu1 %v3155_v16 }
  0x33   :  { %2701 = vmatprep.subr.bf16.mxu1 %v3032_v12  ;;  %2317 = vmatmul.mubr.msk.f32.gmra.mrb[2].mxu0 %vm82_vm0, %v59_v7 }
  0x34   :  { %2724 = vmatpush3.bf16.msra.mxu0 %v3155_v16  ;;  %183 = vmatprep.mubr.f32.mxu0 %v3031_v0 }
  0x35   :  { %2322 = vmatmul.mubr.msk.f32.gmra.mrb[4].mxu1 %vm82_vm0, %v64_v17  ;;  %2731 = vmatprep.subr.bf16.mxu0 %v3032_v12 }
  0x36   :  { %213 = vmatprep.mubr.f32.mxu1 %v3031_v0 }
  0x39   :  { %2323 = vmatmul.mubr.msk.f32.gmra.mrb[6].mxu1 %vm82_vm0, %v65_v18 }
  0x3a   :  { %2483 = vmatprep.mubr.msk.f32.mxu1 %vm3033_vm1, %v3031_v0 }
  0x3d   :  { %2484 = vmatmul.mubr.f32.vlgmr.msra.gmra.mrb[8].mxu1 %v3031_v0 }
  0x3e   :  { %2703 = vmatpush3.bf16.msra.mxu1 %v3178_v21  ;;  %2494 = vmatprep.mubr.msk.f32.mxu1 %vm3033_vm1, %v3031_v0 }
  0x3f   :  { %2704 = vmatprep.subr.bf16.mxu1 %v3032_v12 }
  0x42   :  { %2706 = vmatpush3.bf16.msra.mxu1 %v3182_v24 }
  0x43   :  { %2707 = vmatprep.subr.bf16.mxu1 %v3032_v12 }
  0x45   :  { %2495 = vmatmul.mubr.f32.vlgmr.msra.gmra.mrb[10].mxu1 %v3031_v0 }
  0x46   :  { %2709 = vmatpush3.bf16.msra.mxu1 %v3135_v10  ;;  %2505 = vmatprep.mubr.msk.f32.mxu1 %vm3033_vm1, %v3031_v0 }
  0x47   :  { %2710 = vmatprep.subr.bf16.mxu1 %v3032_v12 }
  0x4a   :  { %2712 = vmatpush3.bf16.msra.mxu1 %v3155_v16 }
  0x4b   :  { %2713 = vmatprep.subr.bf16.mxu1 %v3032_v12 }
 0x100   :  { %v3196_v26 = vpop.f32.mrb[0].mxu1  ;;  %v173_v27 = vpop.f32.mrb[0].mxu0 }
 0x101   :  { %v3198_v28 = vpop.f32.mrb[1].mxu1  ;;  %v3200_v29 = vpop.f32.mrb[1].mxu0  ;;  %v174_v40 = vadd.f32 %v173_v27, %v3213_v37 }
 0x104   :  { %v3202_v31 = vpop.f32.mrb[2].mxu1 }
 0x105   :  { %v3204_v32 = vpop.f32.mrb[3].mxu1 }
 0x106   :  { %v179_v17 = vpop.f32.mrb[2].mxu0 }
 0x107   :  { %v3256_v20 = vpop.f32.mrb[3].mxu0  ;;  %v180_v22 = vadd.f32 %v179_v17, %v3213_v37 }
 0x108   :  { %v3209_v35 = vpop.f32.mrb[4].mxu1 }
 0x109   :  { %v3211_v36 = vpop.f32.mrb[5].mxu1 }
 0x10a   :  { %v212_v30 = vadd.f32 %v3211_v36, %v3218_v45 }
 0x10c   :  { %v3215_v38 = vpop.f32.mrb[6].mxu1 }
 0x10d   :  { %v217_v39 = vpop.f32.mrb[7].mxu1 }
 0x10e   :  { %v218_v46 = vadd.f32 %v217_v39, %v3218_v45 }
 0x110   :  { %v314_v41 = vpop.f32.mrb[8].mxu1 }
 0x111   :  { %v318_v43 = vadd.f32 %v314_v41, %v174_v40  ;;  %v2485_v44 = vpop.f32.mrb[9].mxu1 }
 0x113   :  { %2827 = vtanh.f32 %v318_v43  ;;  %v2324_v52 = vmul.f32 -1.442695, %v318_v43 }
 0x118   :  { %v393_v47 = vpop.f32.mrb[10].mxu1 }
 0x119   :  { %v397_v48 = vadd.f32 %v393_v47, %v218_v46  ;;  %v2496_v49 = vpop.f32.mrb[11].mxu1 }
 0x11b   :  { %2829 = vtanh.f32 %v397_v48  ;;  %v2325_v53 = vmul.f32 -1.442695, %v397_v48 }
 0x11c   :  { %2831 = vpow2.f32 %v2324_v52 }
 0x11d   :  { %v2828_v50 = vpop.eup %2827  ;;  %2833 = vpow2.f32 %v2325_v53 }
 0x11e   :  { %407 = vrot.lane.b32.xlu0 %v2828_v50, %s3034_s2 }
 0x125   :  { %v2830_v51 = vpop.eup %2829 }
 0x126   :  { %431 = vrot.lane.b32.xlu0 %v2830_v51, %s3034_s2  ;;  %v2832_v54 = vpop.eup %2831 }
 0x127   :  { %v401_v55 = vadd.f32 1.0, %v2832_v54  ;;  %v2834_v56 = vpop.eup %2833 }
 0x128   :  { %v425_v57 = vadd.f32 1.0, %v2834_v56 }
 0x129   :  { %2835 = vrcp.f32 %v401_v55 }
 0x12a   :  { %2837 = vrcp.f32 %v425_v57 }
 0x133   :  { %v2836_v58 = vpop.eup %2835 }
 0x134   :  { %v2838_v61 = vpop.eup %2837  ;;  %v405_v1 = vmul.f32 0.0, %v2836_v58 }
 0x135   :  { %v429_v4 = vmul.f32 0.0, %v2838_v61 }
 0x190   :  { %v408_v59 = vpop.permute.xlu0 %407 }
 0x191   :  { %v410_v60 = vmul.f32 %v2836_v58, %v408_v59 }
 0x193   :  { %412 = vrot.lane.b32.xlu1 %v410_v60, %s3035_s13  ;;  %v60_v60 = vld [vmem:[%s3537_s0 + $0x10] sm:$0xff] }
 0x194   :  { %2318 = vmatmul.mubr.msk.f32.gmra.mrb[4].mxu0 %vm82_vm0, %v60_v60 }
 0x195   :  { %189 = vmatprep.mubr.f32.mxu0 %v3031_v0 }
 0x198   :  { %v432_v62 = vpop.permute.xlu0 %431 }
 0x199   :  { %v434_v63 = vmul.f32 %v2838_v61, %v432_v62  ;;  %v61_v62 = vld [vmem:[%s3537_s0 + $0x18] sm:$0xff] }
 0x19a   :  { %2319 = vmatmul.mubr.msk.f32.gmra.mrb[6].mxu0 %vm82_vm0, %v61_v62 }
 0x19b   :  { %436 = vrot.lane.b32.xlu1 %v434_v63, %s3035_s13  ;;  %2527 = vmatprep.mubr.msk.f32.mxu0 %vm3033_vm1, %v3031_v0 }
 0x205   :  { %v413_v2 = vpop.permute.xlu1 %412 }
 0x206   :  { %v3225_v3 = vadd.f32 %v413_v2, %v405_v1 }
 0x208   :  { %2839 = vtanh.f32 %v3225_v3 }
 0x20d   :  { %v437_v5 = vpop.permute.xlu1 %436 }
 0x20e   :  { %v3228_v6 = vadd.f32 %v437_v5, %v429_v4 }
 0x210   :  { %2841 = vtanh.f32 %v3228_v6 }
 0x212   :  { %v2840_v8 = vpop.eup %2839 }
 0x213   :  { %418 = vrot.lane.b32.xlu0 %v2840_v8, %s3034_s2 }
 0x21a   :  { %v2842_v9 = vpop.eup %2841 }
 0x21b   :  { %442 = vrot.lane.b32.xlu1 %v2842_v9, %s3034_s2 }
 0x267   :  { %v185_v5 = vpop.f32.mrb[4].mxu0 }
 0x285   :  { %v419_v11 = vpop.permute.xlu0 %418 }
 0x286   :  { %v421_v13 = vmul.f32 %v2836_v58, %v419_v11 }
 0x288   :  { %447 = vrot.lane.b32.xlu0 %v421_v13, %s3035_s13  ;;  %v186_v13 = vadd.f32 %v185_v5, %v3213_v37 }
 0x28d   :  { %v443_v14 = vpop.permute.xlu1 %442 }
 0x28e   :  { %v445_v15 = vmul.f32 %v2838_v61, %v443_v14 }
 0x290   :  { %452 = vrot.lane.b32.xlu1 %v445_v15, %s3035_s13 }
 0x2fa   :  { %v448_v18 = vpop.permute.xlu0 %447 }
 0x2fb   :  { %450 = vst.msk [vmem:[#allocation3] sm:$0xff] %vm244_vm2, %v448_v18  ;;  %2506 = vmatmul.mubr.msk.f32.vlgmr.msra.gmra.mrb[12].mxu1 %vm244_vm2, %v448_v18  ;;  %v206_v18 = vadd.f32 %v3204_v32, %v3218_v45 }
 0x2fc   :  { %2715 = vmatpush3.bf16.msra.mxu1 %v3178_v21  ;;  %2516 = vmatprep.mubr.msk.f32.mxu1 %vm3033_vm1, %v3031_v0 }
 0x2fd   :  { %2716 = vmatprep.subr.bf16.mxu1 %v3032_v12 }
 0x300   :  { %2718 = vmatpush3.bf16.msra.mxu1 %v3182_v24 }
 0x301   :  { %2725 = vmatprep.subr.bf16.mxu1 %v3032_v12 }
 0x302   :  { %v453_v19 = vpop.permute.xlu1 %452 }
 0x303   :  { %456 = vst.msk [vmem:[#allocation4 + $0x38] sm:$0xff] %vm244_vm2, %v453_v19  ;;  %2517 = vmatmul.mubr.msk.f32.vlgmr.msra.gmra.mrb[14].mxu1 %vm244_vm2, %v453_v19 }
 0x304   :  { %2727 = vmatpush3.bf16.msra.mxu1 %v3178_v21  ;;  %2538 = vmatprep.mubr.msk.f32.mxu1 %vm3033_vm1, %v3031_v0 }
 0x305   :  { %2728 = vmatprep.subr.bf16.mxu1 %v3032_v12 }
 0x308   :  { %2730 = vmatpush3.bf16.msra.mxu1 %v3182_v24 }
 0x309   :  { %2737 = vmatprep.subr.bf16.mxu1 %v3032_v12 }
 0x3ce   :  { %v533_v23 = vpop.f32.mrb[12].mxu1 }
 0x3cf   :  { %v537_v25 = vadd.f32 %v533_v23, %v180_v22  ;;  %v2507_v27 = vpop.f32.mrb[13].mxu1 }
 0x3d1   :  { %2843 = vtanh.f32 %v537_v25  ;;  %v2328_v42 = vmul.f32 -1.442695, %v537_v25 }
 0x3d6   :  { %v614_v33 = vpop.f32.mrb[14].mxu1 }
 0x3d7   :  { %v618_v34 = vadd.f32 %v614_v33, %v212_v30  ;;  %v2518_v39 = vpop.f32.mrb[15].mxu1 }
 0x3d9   :  { %2845 = vtanh.f32 %v618_v34  ;;  %v2329_v43 = vmul.f32 -1.442695, %v618_v34 }
 0x3da   :  { %2847 = vpow2.f32 %v2328_v42 }
 0x3db   :  { %v2844_v40 = vpop.eup %2843  ;;  %2849 = vpow2.f32 %v2329_v43 }
 0x3dc   :  { %628 = vrot.lane.b32.xlu1 %v2844_v40, %s3034_s2 }
 0x3e3   :  { %v2846_v41 = vpop.eup %2845 }
 0x3e4   :  { %652 = vrot.lane.b32.xlu0 %v2846_v41, %s3034_s2  ;;  %v2848_v44 = vpop.eup %2847 }
 0x3e5   :  { %v622_v46 = vadd.f32 1.0, %v2848_v44  ;;  %v2850_v47 = vpop.eup %2849 }
 0x3e6   :  { %v646_v48 = vadd.f32 1.0, %v2850_v47 }
 0x3e7   :  { %2851 = vrcp.f32 %v622_v46 }
 0x3e8   :  { %2853 = vrcp.f32 %v646_v48 }
 0x3f1   :  { %v2852_v36 = vpop.eup %2851 }
 0x3f2   :  { %v2854_v51 = vpop.eup %2853  ;;  %v626_v54 = vmul.f32 %v2852_v36, %v3225_v3 }
 0x3f3   :  { %v650_v57 = vmul.f32 %v2854_v51, %v3228_v6  ;;  %v3288_v6 = vpop.f32.mrb[5].mxu0 }
 0x3f4   :  { %v3290_v7 = vpop.f32.mrb[6].mxu0 }
 0x3f5   :  { %v3292_v8 = vpop.f32.mrb[7].mxu0 }
 0x44e   :  { %v629_v49 = vpop.permute.xlu1 %628 }
 0x44f   :  { %v631_v50 = vmul.f32 %v2852_v36, %v629_v49 }
 0x451   :  { %633 = vrot.lane.b32.xlu1 %v631_v50, %s3035_s13 }
 0x456   :  { %v653_v52 = vpop.permute.xlu0 %652 }
 0x457   :  { %v655_v53 = vmul.f32 %v2854_v51, %v653_v52 }
 0x459   :  { %657 = vrot.lane.b32.xlu0 %v655_v53, %s3035_s13 }
 0x4c3   :  { %v634_v55 = vpop.permute.xlu1 %633 }
 0x4c4   :  { %v3266_v56 = vadd.f32 %v634_v55, %v626_v54 }
 0x4c6   :  { %2855 = vtanh.f32 %v3266_v56 }
 0x4cb   :  { %v658_v58 = vpop.permute.xlu0 %657 }
 0x4cc   :  { %v3270_v59 = vadd.f32 %v658_v58, %v650_v57 }
 0x4ce   :  { %2857 = vtanh.f32 %v3270_v59 }
 0x4d0   :  { %v2856_v61 = vpop.eup %2855 }
 0x4d1   :  { %639 = vrot.lane.b32.xlu1 %v2856_v61, %s3034_s2  ;;  %v192_v61 = vadd.f32 %v3290_v7, %v3213_v37 }
 0x4d8   :  { %v2858_v63 = vpop.eup %2857 }
 0x4d9   :  { %663 = vrot.lane.b32.xlu0 %v2858_v63, %s3034_s2 }
 0x543   :  { %v640_v1 = vpop.permute.xlu1 %639 }
 0x544   :  { %v642_v2 = vmul.f32 %v2852_v36, %v640_v1 }
 0x546   :  { %668 = vrot.lane.b32.xlu1 %v642_v2, %s3035_s13  ;;  %v200_v2 = vadd.f32 %v3198_v28, %v3218_v45 }
 0x54b   :  { %v664_v3 = vpop.permute.xlu0 %663 }
 0x54c   :  { %v666_v4 = vmul.f32 %v2854_v51, %v664_v3 }
 0x54e   :  { %674 = vrot.lane.b32.xlu0 %v666_v4, %s3035_s13 }
 0x5b8   :  { %v669_v9 = vpop.permute.xlu1 %668 }
 0x5b9   :  { %672 = vst.msk [vmem:[#allocation3 + $0x8] sm:$0xff] %vm244_vm2, %v669_v9  ;;  %2528 = vmatmul.mubr.msk.f32.vlgmr.msra.gmra.mrb[8].mxu0 %vm244_vm2, %v669_v9 }
 0x5ba   :  { %2733 = vmatpush3.bf16.msra.mxu0 %v3135_v10  ;;  %2549 = vmatprep.mubr.msk.f32.mxu0 %vm3033_vm1, %v3031_v0 }
 0x5bb   :  { %2734 = vmatprep.subr.bf16.mxu0 %v3032_v12 }
 0x5be   :  { %2736 = vmatpush3.bf16.msra.mxu0 %v3155_v16 }
 0x5bf   :  { %2743 = vmatprep.subr.bf16.mxu0 %v3032_v12 }
 0x5c0   :  { %v675_v11 = vpop.permute.xlu0 %674 }
 0x5c1   :  { %678 = vst.msk [vmem:[#allocation4 + $0x30] sm:$0xff] %vm244_vm2, %v675_v11  ;;  %2539 = vmatmul.mubr.msk.f32.vlgmr.msra.gmra.mrb[16].mxu1 %vm244_vm2, %v675_v11 }
 0x5c2   :  { %2739 = vmatpush3.bf16.msra.mxu1 %v3178_v21  ;;  %2560 = vmatprep.mubr.msk.f32.mxu1 %vm3033_vm1, %v3031_v0 }
 0x5c3   :  { %2740 = vmatprep.subr.bf16.mxu1 %v3032_v12 }
 0x5c6   :  { %2742 = vmatpush3.bf16.msra.mxu1 %v3182_v24 }
 0x5c7   :  { %2749 = vmatprep.subr.bf16.mxu1 %v3032_v12 }
 0x68c   :  { %v755_v14 = vpop.f32.mrb[8].mxu0 }
 0x68d   :  { %v759_v15 = vadd.f32 %v755_v14, %v186_v13  ;;  %v2529_v17 = vpop.f32.mrb[9].mxu0 }
 0x68f   :  { %2859 = vtanh.f32 %v759_v15  ;;  %v2332_v30 = vmul.f32 -1.442695, %v759_v15 }
 0x694   :  { %v836_v19 = vpop.f32.mrb[16].mxu1 }
 0x695   :  { %v840_v22 = vadd.f32 %v836_v19, %v206_v18  ;;  %v2540_v23 = vpop.f32.mrb[17].mxu1 }
 0x697   :  { %2861 = vtanh.f32 %v840_v22  ;;  %v2333_v33 = vmul.f32 -1.442695, %v840_v22 }
 0x698   :  { %2863 = vpow2.f32 %v2332_v30 }
 0x699   :  { %v2860_v25 = vpop.eup %2859  ;;  %2865 = vpow2.f32 %v2333_v33 }
 0x69a   :  { %850 = vrot.lane.b32.xlu1 %v2860_v25, %s3034_s2 }
 0x6a1   :  { %v2862_v27 = vpop.eup %2861 }
 0x6a2   :  { %874 = vrot.lane.b32.xlu0 %v2862_v27, %s3034_s2  ;;  %v2864_v34 = vpop.eup %2863 }
 0x6a3   :  { %v844_v39 = vadd.f32 1.0, %v2864_v34  ;;  %v2866_v40 = vpop.eup %2865 }
 0x6a4   :  { %v868_v41 = vadd.f32 1.0, %v2866_v40 }
 0x6a5   :  { %2867 = vrcp.f32 %v844_v39 }
 0x6a6   :  { %2869 = vrcp.f32 %v868_v41 }
 0x6af   :  { %v2868_v32 = vpop.eup %2867 }
 0x6b0   :  { %v2870_v44 = vpop.eup %2869  ;;  %v848_v48 = vmul.f32 %v2868_v32, %v3266_v56 }
 0x6b1   :  { %v872_v50 = vmul.f32 %v2870_v44, %v3270_v59 }
 0x70c   :  { %v851_v42 = vpop.permute.xlu1 %850 }
 0x70d   :  { %v853_v43 = vmul.f32 %v2868_v32, %v851_v42 }
 0x70f   :  { %855 = vrot.lane.b32.xlu1 %v853_v43, %s3035_s13 }
 0x714   :  { %v875_v46 = vpop.permute.xlu0 %874 }
 0x715   :  { %v877_v47 = vmul.f32 %v2870_v44, %v875_v46 }
 0x717   :  { %879 = vrot.lane.b32.xlu0 %v877_v47, %s3035_s13 }
 0x781   :  { %v856_v36 = vpop.permute.xlu1 %855 }
 0x782   :  { %v3318_v49 = vadd.f32 %v856_v36, %v848_v48 }
 0x784   :  { %2871 = vtanh.f32 %v3318_v49 }
 0x789   :  { %v880_v51 = vpop.permute.xlu0 %879 }
 0x78a   :  { %v3322_v52 = vadd.f32 %v880_v51, %v872_v50 }
 0x78c   :  { %2873 = vtanh.f32 %v3322_v52 }
 0x78e   :  { %v2872_v53 = vpop.eup %2871 }
 0x78f   :  { %861 = vrot.lane.b32.xlu1 %v2872_v53, %s3034_s2  ;;  %v194_v53 = vadd.f32 %v3292_v8, %v3218_v45 }
 0x796   :  { %v2874_v54 = vpop.eup %2873 }
 0x797   :  { %885 = vrot.lane.b32.xlu0 %v2874_v54, %s3034_s2 }
 0x801   :  { %v862_v55 = vpop.permute.xlu1 %861 }
 0x802   :  { %v864_v56 = vmul.f32 %v2868_v32, %v862_v55 }
 0x804   :  { %890 = vrot.lane.b32.xlu1 %v864_v56, %s3035_s13 }
 0x809   :  { %v886_v57 = vpop.permute.xlu0 %885 }
 0x80a   :  { %v888_v58 = vmul.f32 %v2870_v44, %v886_v57 }
 0x80c   :  { %896 = vrot.lane.b32.xlu0 %v888_v58, %s3035_s13 }
 0x876   :  { %v891_v59 = vpop.permute.xlu1 %890 }
 0x877   :  { %894 = vst.msk [vmem:[#allocation3 + $0x10] sm:$0xff] %vm244_vm2, %v891_v59  ;;  %2550 = vmatmul.mubr.msk.f32.vlgmr.msra.gmra.mrb[10].mxu0 %vm244_vm2, %v891_v59 }
 0x878   :  { %2745 = vmatpush3.bf16.msra.mxu0 %v3135_v10  ;;  %2571 = vmatprep.mubr.msk.f32.mxu0 %vm3033_vm1, %v3031_v0 }
 0x879   :  { %2746 = vmatprep.subr.bf16.mxu0 %v3032_v12 }
 0x87c   :  { %2748 = vmatpush3.bf16.msra.mxu0 %v3155_v16 }
 0x87d   :  { %2755 = vmatprep.subr.bf16.mxu0 %v3032_v12 }
 0x87e   :  { %v897_v60 = vpop.permute.xlu0 %896 }
 0x87f   :  { %900 = vst.msk [vmem:[#allocation4 + $0x28] sm:$0xff] %vm244_vm2, %v897_v60  ;;  %2561 = vmatmul.mubr.msk.f32.vlgmr.msra.gmra.mrb[18].mxu1 %vm244_vm2, %v897_v60 }
 0x880   :  { %2751 = vmatpush3.bf16.msra.mxu1 %v3178_v21  ;;  %2582 = vmatprep.mubr.msk.f32.mxu1 %vm3033_vm1, %v3031_v0 }
 0x881   :  { %2752 = vmatprep.subr.bf16.mxu1 %v3032_v12 }
 0x884   :  { %2754 = vmatpush3.bf16.msra.mxu1 %v3182_v24 }
 0x885   :  { %2761 = vmatprep.subr.bf16.mxu1 %v3032_v12 }
 0x94a   :  { %v977_v62 = vpop.f32.mrb[10].mxu0 }
 0x94b   :  { %v981_v63 = vadd.f32 %v977_v62, %v192_v61  ;;  %v2551_v1 = vpop.f32.mrb[11].mxu0 }
 0x94d   :  { %2875 = vtanh.f32 %v981_v63  ;;  %v2336_v13 = vmul.f32 -1.442695, %v981_v63 }
 0x952   :  { %v1058_v3 = vpop.f32.mrb[18].mxu1 }
 0x953   :  { %v1062_v4 = vadd.f32 %v1058_v3, %v200_v2  ;;  %v2562_v5 = vpop.f32.mrb[19].mxu1 }
 0x955   :  { %2877 = vtanh.f32 %v1062_v4  ;;  %v2337_v7 = vmul.f32 -1.442695, %v1062_v4 }
 0x956   :  { %2879 = vpow2.f32 %v2336_v13 }
 0x957   :  { %v2876_v9 = vpop.eup %2875  ;;  %2881 = vpow2.f32 %v2337_v7 }
 0x958   :  { %1072 = vrot.lane.b32.xlu1 %v2876_v9, %s3034_s2 }
 0x95f   :  { %v2878_v11 = vpop.eup %2877 }
 0x960   :  { %1096 = vrot.lane.b32.xlu0 %v2878_v11, %s3034_s2  ;;  %v2880_v14 = vpop.eup %2879 }
 0x961   :  { %v1066_v15 = vadd.f32 1.0, %v2880_v14  ;;  %v2882_v17 = vpop.eup %2881 }
 0x962   :  { %v1090_v18 = vadd.f32 1.0, %v2882_v17 }
 0x963   :  { %2883 = vrcp.f32 %v1066_v15 }
 0x964   :  { %2885 = vrcp.f32 %v1090_v18 }
 0x96d   :  { %v2884_v28 = vpop.eup %2883 }
 0x96e   :  { %v2886_v23 = vpop.eup %2885  ;;  %v1070_v30 = vmul.f32 %v2884_v28, %v3318_v49  ;;  %v198_v49 = vadd.f32 %v3196_v26, %v3213_v37 }
 0x96f   :  { %v1094_v39 = vmul.f32 %v2886_v23, %v3322_v52 }
 0x9ca   :  { %v1073_v19 = vpop.permute.xlu1 %1072 }
 0x9cb   :  { %v1075_v22 = vmul.f32 %v2884_v28, %v1073_v19 }
 0x9cd   :  { %1077 = vrot.lane.b32.xlu1 %v1075_v22, %s3035_s13 }
 0x9d2   :  { %v1097_v25 = vpop.permute.xlu0 %1096 }
 0x9d3   :  { %v1099_v27 = vmul.f32 %v2886_v23, %v1097_v25 }
 0x9d5   :  { %1101 = vrot.lane.b32.xlu0 %v1099_v27, %s3035_s13 }
 0xa3f   :  { %v1078_v33 = vpop.permute.xlu1 %1077 }
 0xa40   :  { %v3354_v34 = vadd.f32 %v1078_v33, %v1070_v30 }
 0xa42   :  { %2887 = vtanh.f32 %v3354_v34 }
 0xa47   :  { %v1102_v40 = vpop.permute.xlu0 %1101 }
 0xa48   :  { %v3358_v41 = vadd.f32 %v1102_v40, %v1094_v39 }
 0xa4a   :  { %2889 = vtanh.f32 %v3358_v41 }
 0xa4c   :  { %v2888_v32 = vpop.eup %2887 }
 0xa4d   :  { %1083 = vrot.lane.b32.xlu1 %v2888_v32, %s3034_s2 }
 0xa54   :  { %v2890_v42 = vpop.eup %2889 }
 0xa55   :  { %1107 = vrot.lane.b32.xlu0 %v2890_v42, %s3034_s2 }
 0xabf   :  { %v1084_v43 = vpop.permute.xlu1 %1083 }
 0xac0   :  { %v1086_v44 = vmul.f32 %v2884_v28, %v1084_v43 }
 0xac2   :  { %1112 = vrot.lane.b32.xlu1 %v1086_v44, %s3035_s13 }
 0xac7   :  { %v1108_v46 = vpop.permute.xlu0 %1107 }
 0xac8   :  { %v1110_v47 = vmul.f32 %v2886_v23, %v1108_v46 }
 0xaca   :  { %1118 = vrot.lane.b32.xlu0 %v1110_v47, %s3035_s13 }
 0xb34   :  { %v1113_v48 = vpop.permute.xlu1 %1112 }
 0xb35   :  { %1116 = vst.msk [vmem:[#allocation3 + $0x18] sm:$0xff] %vm244_vm2, %v1113_v48  ;;  %2572 = vmatmul.mubr.msk.f32.vlgmr.msra.gmra.mrb[12].mxu0 %vm244_vm2, %v1113_v48 }
 0xb36   :  { %2757 = vmatpush3.bf16.msra.mxu0 %v3135_v10  ;;  %2593 = vmatprep.mubr.msk.f32.mxu0 %vm3033_vm1, %v3031_v0 }
 0xb37   :  { %2758 = vmatprep.subr.bf16.mxu0 %v3032_v12 }
 0xb3a   :  { %2760 = vmatpush3.bf16.msra.mxu0 %v3155_v16 }
 0xb3b   :  { %2767 = vmatprep.subr.bf16.mxu0 %v3032_v12 }
 0xb3c   :  { %v1119_v36 = vpop.permute.xlu0 %1118 }
 0xb3d   :  { %1122 = vst.msk [vmem:[#allocation4 + $0x20] sm:$0xff] %vm244_vm2, %v1119_v36  ;;  %2583 = vmatmul.mubr.msk.f32.vlgmr.msra.gmra.mrb[20].mxu1 %vm244_vm2, %v1119_v36 }
 0xb3e   :  { %2763 = vmatpush3.bf16.msra.mxu1 %v3178_v21  ;;  %2604 = vmatprep.mubr.msk.f32.mxu1 %vm3033_vm1, %v3031_v0 }
 0xb3f   :  { %2764 = vmatprep.subr.bf16.mxu1 %v3032_v12 }
 0xb42   :  { %2766 = vmatpush3.bf16.msra.mxu1 %v3182_v24 }
 0xb43   :  { %2773 = vmatprep.subr.bf16.mxu1 %v3032_v12 }
 0xc08   :  { %v1196_v50 = vpop.f32.mrb[12].mxu0 }
 0xc09   :  { %v1200_v51 = vadd.f32 %v1196_v50, %v198_v49  ;;  %v2573_v52 = vpop.f32.mrb[13].mxu0 }
 0xc0b   :  { %2891 = vtanh.f32 %v1200_v51  ;;  %v2340_v59 = vmul.f32 -1.442695, %v1200_v51 }
 0xc10   :  { %v1274_v54 = vpop.f32.mrb[20].mxu1 }
 0xc11   :  { %v1278_v55 = vadd.f32 %v1274_v54, %v194_v53  ;;  %v2584_v56 = vpop.f32.mrb[21].mxu1 }
 0xc13   :  { %2893 = vtanh.f32 %v1278_v55  ;;  %v2341_v26 = vmul.f32 -1.442695, %v1278_v55 }
 0xc14   :  { %2895 = vpow2.f32 %v2340_v59 }
 0xc15   :  { %v2892_v57 = vpop.eup %2891  ;;  %2897 = vpow2.f32 %v2341_v26 }
 0xc16   :  { %1288 = vrot.lane.b32.xlu1 %v2892_v57, %s3034_s2 }
 0xc1d   :  { %v2894_v58 = vpop.eup %2893 }
 0xc1e   :  { %1312 = vrot.lane.b32.xlu0 %v2894_v58, %s3034_s2  ;;  %v2896_v60 = vpop.eup %2895 }
 0xc1f   :  { %v1282_v61 = vadd.f32 1.0, %v2896_v60  ;;  %v2898_v62 = vpop.eup %2897 }
 0xc20   :  { %v1306_v63 = vadd.f32 1.0, %v2898_v62 }
 0xc21   :  { %2899 = vrcp.f32 %v1282_v61 }
 0xc22   :  { %2901 = vrcp.f32 %v1306_v63 }
 0xc2b   :  { %v2900_v8 = vpop.eup %2899 }
 0xc2c   :  { %v2902_v3 = vpop.eup %2901  ;;  %v1286_v9 = vmul.f32 %v2900_v8, %v3354_v34  ;;  %v188_v34 = vadd.f32 %v3288_v6, %v3218_v45 }
 0xc2d   :  { %v1310_v7 = vmul.f32 %v2902_v3, %v3358_v41 }
 0xc88   :  { %v1289_v1 = vpop.permute.xlu1 %1288 }
 0xc89   :  { %v1291_v2 = vmul.f32 %v2900_v8, %v1289_v1 }
 0xc8b   :  { %1293 = vrot.lane.b32.xlu1 %v1291_v2, %s3035_s13 }
 0xc90   :  { %v1313_v4 = vpop.permute.xlu0 %1312 }
 0xc91   :  { %v1315_v5 = vmul.f32 %v2902_v3, %v1313_v4  ;;  %v182_v4 = vadd.f32 %v3256_v20, %v3218_v45 }
 0xc93   :  { %1317 = vrot.lane.b32.xlu0 %v1315_v5, %s3035_s13 }
 0xcfd   :  { %v1294_v11 = vpop.permute.xlu1 %1293 }
 0xcfe   :  { %v3390_v13 = vadd.f32 %v1294_v11, %v1286_v9 }
 0xd00   :  { %2903 = vtanh.f32 %v3390_v13 }
 0xd05   :  { %v1318_v14 = vpop.permute.xlu0 %1317 }
 0xd06   :  { %v3394_v15 = vadd.f32 %v1318_v14, %v1310_v7 }
 0xd08   :  { %2905 = vtanh.f32 %v3394_v15 }
 0xd0a   :  { %v2904_v17 = vpop.eup %2903 }
 0xd0b   :  { %1299 = vrot.lane.b32.xlu1 %v2904_v17, %s3034_s2 }
 0xd12   :  { %v2906_v18 = vpop.eup %2905 }
 0xd13   :  { %1323 = vrot.lane.b32.xlu0 %v2906_v18, %s3034_s2 }
 0xd7d   :  { %v1300_v28 = vpop.permute.xlu1 %1299 }
 0xd7e   :  { %v1302_v19 = vmul.f32 %v2900_v8, %v1300_v28  ;;  %v210_v8 = vadd.f32 %v3209_v35, %v3213_v37 }
 0xd80   :  { %1328 = vrot.lane.b32.xlu1 %v1302_v19, %s3035_s13 }
 0xd85   :  { %v1324_v22 = vpop.permute.xlu0 %1323 }
 0xd86   :  { %v1326_v23 = vmul.f32 %v2902_v3, %v1324_v22 }
 0xd88   :  { %1334 = vrot.lane.b32.xlu0 %v1326_v23, %s3035_s13 }
 0xdf2   :  { %v1329_v25 = vpop.permute.xlu1 %1328 }
 0xdf3   :  { %1332 = vst.msk [vmem:[#allocation3 + $0x20] sm:$0xff] %vm244_vm2, %v1329_v25  ;;  %2594 = vmatmul.mubr.msk.f32.vlgmr.msra.gmra.mrb[14].mxu0 %vm244_vm2, %v1329_v25 }
 0xdf4   :  { %2769 = vmatpush3.bf16.msra.mxu0 %v3135_v10  ;;  %2615 = vmatprep.mubr.msk.f32.mxu0 %vm3033_vm1, %v3031_v0  ;;  %v204_v10 = vadd.f32 %v3202_v31, %v3213_v37 }
 0xdf5   :  { %2770 = vmatprep.subr.bf16.mxu0 %v3032_v12 }
 0xdf8   :  { %2772 = vmatpush3.bf16.msra.mxu0 %v3155_v16 }
 0xdf9   :  { %2779 = vmatprep.subr.bf16.mxu0 %v3032_v12 }
 0xdfa   :  { %v1335_v27 = vpop.permute.xlu0 %1334 }
 0xdfb   :  { %1338 = vst.msk [vmem:[#allocation4 + $0x18] sm:$0xff] %vm244_vm2, %v1335_v27  ;;  %2605 = vmatmul.mubr.msk.f32.vlgmr.msra.gmra.mrb[22].mxu1 %vm244_vm2, %v1335_v27 }
 0xdfc   :  { %2775 = vmatpush3.bf16.msra.mxu1 %v3178_v21  ;;  %2626 = vmatprep.mubr.msk.f32.mxu1 %vm3033_vm1, %v3031_v0 }
 0xdfd   :  { %2776 = vmatprep.subr.bf16.mxu1 %v3032_v12 }
 0xe00   :  { %2778 = vmatpush3.bf16.msra.mxu1 %v3182_v24 }
 0xe01   :  { %2785 = vmatprep.subr.bf16.mxu1 %v3032_v12 }
 0xec6   :  { %v1412_v16 = vpop.f32.mrb[14].mxu0 }
 0xec7   :  { %v1416_v30 = vadd.f32 %v1412_v16, %v204_v10  ;;  %v2595_v33 = vpop.f32.mrb[15].mxu0 }
 0xec9   :  { %2907 = vtanh.f32 %v1416_v30  ;;  %v2344_v32 = vmul.f32 -1.442695, %v1416_v30 }
 0xece   :  { %v1490_v21 = vpop.f32.mrb[22].mxu1 }
 0xecf   :  { %v1494_v39 = vadd.f32 %v1490_v21, %v188_v34  ;;  %v2606_v40 = vpop.f32.mrb[23].mxu1  ;;  %v1772_v21 = vld [vmem:[%s3540_s3] sm:$0xff] }
 0xed0   :  { %v1774_v40 = vld [vmem:[%s3540_s3 + $0x10] sm:$0xff] }
 0xed1   :  { %2909 = vtanh.f32 %v1494_v39  ;;  %v2345_v31 = vmul.f32 -1.442695, %v1494_v39  ;;  %v1773_v39 = vld [vmem:[%s3540_s3 + $0x8] sm:$0xff] }
 0xed2   :  { %2911 = vpow2.f32 %v2344_v32 }
 0xed3   :  { %v2908_v41 = vpop.eup %2907  ;;  %2913 = vpow2.f32 %v2345_v31 }
 0xed4   :  { %1504 = vrot.lane.b32.xlu1 %v2908_v41, %s3034_s2  ;;  %v2780_v41 = vpack.c.bf16 %v1773_v39, %v1772_v21  ;;  %v1996_v39 = vld [vmem:[%s3542_s5 + $0x10] sm:$0xff] }
 0xedb   :  { %v2910_v24 = vpop.eup %2909 }
 0xedc   :  { %1528 = vrot.lane.b32.xlu0 %v2910_v24, %s3034_s2  ;;  %v2912_v42 = vpop.eup %2911  ;;  %v1775_v24 = vld [vmem:[%s3540_s3 + $0x18] sm:$0xff] }
 0xedd   :  { %v1498_v43 = vadd.f32 1.0, %v2912_v42  ;;  %v2914_v44 = vpop.eup %2913  ;;  %v2783_v31 = vpack.c.bf16 %v1775_v24, %v1774_v40  ;;  %v1997_v40 = vld [vmem:[%s3542_s5 + $0x18] sm:$0xff] }
 0xede   :  { %v1522_v46 = vadd.f32 1.0, %v2914_v44  ;;  %v1851_v44 = vld [vmem:[#allocation5 + $0x8] sm:$0xff]  ;;  %v2803_v24 = vpack.c.bf16 %v1997_v40, %v1996_v39 }
 0xedf   :  { %2915 = vrcp.f32 %v1498_v43  ;;  %v1850_v43 = vld [vmem:[#allocation5] sm:$0xff] }
 0xee0   :  { %2917 = vrcp.f32 %v1522_v46  ;;  %v2786_v46 = vpack.c.bf16 %v1851_v44, %v1850_v43  ;;  %v2002_v43 = vld [vmem:[#allocation4 + $0x20] sm:$0xff]  ;;  %v2003_v44 = vld [vmem:[#allocation4 + $0x28] sm:$0xff] }
 0xee9   :  { %v2916_v6 = vpop.eup %2915 }
 0xeea   :  { %v2918_v36 = vpop.eup %2917  ;;  %v1502_v51 = vmul.f32 %v2916_v6, %v3390_v13 }
 0xeeb   :  { %v1526_v54 = vmul.f32 %v2918_v36, %v3394_v15 }
 0xf46   :  { %v1505_v47 = vpop.permute.xlu1 %1504 }
 0xf47   :  { %v1507_v48 = vmul.f32 %v2916_v6, %v1505_v47  ;;  %v1853_v47 = vld [vmem:[#allocation5 + $0x18] sm:$0xff] }
 0xf49   :  { %1509 = vrot.lane.b32.xlu1 %v1507_v48, %s3035_s13 }
 0xf4e   :  { %v1529_v49 = vpop.permute.xlu0 %1528 }
 0xf4f   :  { %v1531_v50 = vmul.f32 %v2918_v36, %v1529_v49 }
 0xf51   :  { %1533 = vrot.lane.b32.xlu0 %v1531_v50, %s3035_s13 }
 0xfbb   :  { %v1510_v52 = vpop.permute.xlu1 %1509 }
 0xfbc   :  { %v1512_v53 = vadd.f32 %v1510_v52, %v1502_v51 }
 0xfbe   :  { %2919 = vtanh.f32 %v1512_v53 }
 0xfc3   :  { %v1534_v55 = vpop.permute.xlu0 %1533 }
 0xfc4   :  { %v1536_v56 = vadd.f32 %v1534_v55, %v1526_v54 }
 0xfc6   :  { %2921 = vtanh.f32 %v1536_v56 }
 0xfc8   :  { %v2920_v57 = vpop.eup %2919 }
 0xfc9   :  { %1515 = vrot.lane.b32.xlu1 %v2920_v57, %s3034_s2  ;;  %v176_v57 = vadd.f32 %v3200_v29, %v3218_v45 }
 0xfd0   :  { %v2922_v58 = vpop.eup %2921 }
 0xfd1   :  { %1539 = vrot.lane.b32.xlu0 %v2922_v58, %s3034_s2 }
0x103b   :  { %v1516_v59 = vpop.permute.xlu1 %1515 }
0x103c   :  { %v1518_v26 = vmul.f32 %v2916_v6, %v1516_v59  ;;  %v1852_v6 = vld [vmem:[#allocation5 + $0x10] sm:$0xff] }
0x103d   :  { %v2789_v48 = vpack.c.bf16 %v1853_v47, %v1852_v6  ;;  %v2005_v6 = vld [vmem:[#allocation4 + $0x38] sm:$0xff]  ;;  %v1986_v47 = vld [vmem:[#allocation3] sm:$0xff] }
0x103e   :  { %1544 = vrot.lane.b32.xlu1 %v1518_v26, %s3035_s13 }
0x1043   :  { %v1540_v60 = vpop.permute.xlu0 %1539 }
0x1044   :  { %v1542_v61 = vmul.f32 %v2918_v36, %v1540_v60 }
0x1046   :  { %1550 = vrot.lane.b32.xlu0 %v1542_v61, %s3035_s13 }
0x10b0   :  { %v1545_v62 = vpop.permute.xlu1 %1544 }
0x10b1   :  { %1548 = vst.msk [vmem:[#allocation3 + $0x28] sm:$0xff] %vm244_vm2, %v1545_v62  ;;  %2616 = vmatmul.mubr.msk.f32.vlgmr.msra.gmra.mrb[16].mxu0 %vm244_vm2, %v1545_v62 }
0x10b2   :  { %2637 = vmatprep.mubr.msk.f32.mxu0 %vm3033_vm1, %v3031_v0  ;;  %2781 = vmatpush3.bf16.msra.mxu0 %v2780_v41 }
0x10b3   :  { %2782 = vmatprep.subr.bf16.mxu0 %v3032_v12 }
0x10b6   :  { %2784 = vmatpush3.bf16.msra.mxu0 %v2783_v31 }
0x10b8   :  { %v1551_v63 = vpop.permute.xlu0 %1550 }
0x10b9   :  { %1554 = vst.msk [vmem:[#allocation4 + $0x10] sm:$0xff] %vm244_vm2, %v1551_v63  ;;  %2627 = vmatmul.mubr.msk.f32.vlgmr.msra.gmra.mrb[24].mxu1 %vm244_vm2, %v1551_v63 }
0x10ba   :  { %2648 = vmatprep.mubr.msk.f32.mxu1 %vm3033_vm1, %v3031_v0  ;;  %2787 = vmatpush3.bf16.msra.mxu1 %v2786_v46  ;;  %v2004_v46 = vld [vmem:[#allocation4 + $0x30] sm:$0xff] }
0x10bb   :  { %2788 = vmatprep.subr.bf16.mxu1 %v3032_v12  ;;  %v216_v12 = vadd.f32 %v3215_v38, %v3213_v37 }
0x10be   :  { %2790 = vmatpush3.bf16.msra.mxu1 %v2789_v48  ;;  %v1987_v48 = vld [vmem:[#allocation3 + $0x8] sm:$0xff] }
0x10c0   :  { %v2000_v31 = vld [vmem:[#allocation4 + $0x10] sm:$0xff] }
0x1184   :  { %v1628_v1 = vpop.f32.mrb[16].mxu0 }
0x1185   :  { %v1632_v2 = vadd.f32 %v1628_v1, %v210_v8  ;;  %v2617_v3 = vpop.f32.mrb[17].mxu0 }
0x1187   :  { %2923 = vtanh.f32 %v1632_v2  ;;  %v2348_v0 = vmul.f32 -1.442695, %v1632_v2 }
0x118c   :  { %v1706_v5 = vpop.f32.mrb[24].mxu1 }
0x118d   :  { %v1710_v9 = vadd.f32 %v1706_v5, %v182_v4  ;;  %v2628_v11 = vpop.f32.mrb[25].mxu1 }
0x118f   :  { %2925 = vtanh.f32 %v1710_v9  ;;  %v2349_v35 = vmul.f32 -1.442695, %v1710_v9 }
0x1190   :  { %2927 = vpow2.f32 %v2348_v0 }
0x1191   :  { %v2924_v13 = vpop.eup %2923  ;;  %2929 = vpow2.f32 %v2349_v35 }
0x1192   :  { %1720 = vrot.lane.b32.xlu1 %v2924_v13, %s3034_s2 }
0x1199   :  { %v2926_v7 = vpop.eup %2925 }
0x119a   :  { %1744 = vrot.lane.b32.xlu0 %v2926_v7, %s3034_s2  ;;  %v2928_v14 = vpop.eup %2927 }
0x119b   :  { %v1714_v15 = vadd.f32 1.0, %v2928_v14  ;;  %v2930_v17 = vpop.eup %2929 }
0x119c   :  { %v1738_v18 = vadd.f32 1.0, %v2930_v17  ;;  %v2006_v17 = vld [vmem:[#allocation8] sm:$0xff] }
0x119d   :  { %2931 = vrcp.f32 %v1714_v15 }
0x119e   :  { %2933 = vrcp.f32 %v1738_v18  ;;  %v2007_v18 = vld [vmem:[#allocation8 + $0x8] sm:$0xff] }
0x11a7   :  { %v2932_v20 = vpop.eup %2931 }
0x11a8   :  { %v2934_v22 = vpop.eup %2933  ;;  %v1718_v27 = vmul.f32 %v2932_v20, %v1512_v53 }
0x11a9   :  { %v1742_v30 = vmul.f32 %v2934_v22, %v1536_v56 }
0x1204   :  { %v1721_v28 = vpop.permute.xlu1 %1720 }
0x1205   :  { %v1723_v19 = vmul.f32 %v2932_v20, %v1721_v28  ;;  %v2008_v28 = vld [vmem:[#allocation8 + $0x10] sm:$0xff] }
0x1207   :  { %1725 = vrot.lane.b32.xlu1 %v1723_v19, %s3035_s13  ;;  %v2009_v19 = vld [vmem:[#allocation8 + $0x18] sm:$0xff] }
0x120c   :  { %v1745_v23 = vpop.permute.xlu0 %1744 }
0x120d   :  { %v1747_v25 = vmul.f32 %v2934_v22, %v1745_v23 }
0x120f   :  { %1749 = vrot.lane.b32.xlu0 %v1747_v25, %s3035_s13 }
0x1279   :  { %v1726_v10 = vpop.permute.xlu1 %1725 }
0x127a   :  { %v3447_v16 = vadd.f32 %v1726_v10, %v1718_v27  ;;  %v1994_v27 = vld [vmem:[%s3542_s5] sm:$0xff]  ;;  %v1995_v10 = vld [vmem:[%s3542_s5 + $0x8] sm:$0xff] }
0x127c   :  { %2935 = vtanh.f32 %v3447_v16 }
0x1281   :  { %v1750_v33 = vpop.permute.xlu0 %1749 }
0x1282   :  { %v3450_v34 = vadd.f32 %v1750_v33, %v1742_v30  ;;  %v2799_v30 = vpack.c.bf16 %v1995_v10, %v1994_v27 }
0x1284   :  { %2937 = vtanh.f32 %v3450_v34 }
0x1286   :  { %v2936_v32 = vpop.eup %2935 }
0x1287   :  { %1731 = vrot.lane.b32.xlu1 %v2936_v32, %s3034_s2 }
0x128e   :  { %v2938_v42 = vpop.eup %2937 }
0x128f   :  { %1755 = vrot.lane.b32.xlu0 %v2938_v42, %s3034_s2  ;;  %v2001_v42 = vld [vmem:[#allocation4 + $0x18] sm:$0xff] }
0x12f9   :  { %v1732_v36 = vpop.permute.xlu1 %1731 }
0x12fa   :  { %v1734_v49 = vmul.f32 %v2932_v20, %v1732_v36  ;;  %v2791_v20 = vpack.c.bf16 %v2007_v18, %v2006_v17  ;;  %v1988_v36 = vld [vmem:[#allocation3 + $0x10] sm:$0xff] }
0x12fc   :  { %1760 = vrot.lane.b32.xlu1 %v1734_v49, %s3035_s13  ;;  %2792 = vmatprep.subr.bf16.mxu0 %v2791_v20  ;;  %v1989_v49 = vld [vmem:[#allocation3 + $0x18] sm:$0xff] }
0x1301   :  { %v1756_v50 = vpop.permute.xlu0 %1755 }
0x1302   :  { %v1758_v51 = vmul.f32 %v2934_v22, %v1756_v50  ;;  %v2795_v22 = vpack.c.bf16 %v2009_v19, %v2008_v28  ;;  %v1990_v50 = vld [vmem:[#allocation3 + $0x20] sm:$0xff] }
0x1304   :  { %1766 = vrot.lane.b32.xlu0 %v1758_v51, %s3035_s13  ;;  %v1991_v51 = vld [vmem:[#allocation3 + $0x28] sm:$0xff] }
0x136e   :  { %v1761_v52 = vpop.permute.xlu1 %1760 }
0x136f   :  { %1764 = vst.msk [vmem:[#allocation3 + $0x30] sm:$0xff] %vm244_vm2, %v1761_v52  ;;  %2638 = vmatmul.mubr.msk.f32.vlgmr.msra.gmra.mrb[18].mxu0 %vm244_vm2, %v1761_v52 }
0x1370   :  { %2794 = vmatpush3.bf16.msra.mxu0 %v2791_v20 }
0x1371   :  { %2796 = vmatprep.subr.bf16.mxu0 %v2795_v22 }
0x1374   :  { %2798 = vmatpush3.bf16.msra.mxu0 %v2795_v22 }
0x1375   :  { %2800 = vmatprep.subr.bf16.mxu0 %v2799_v30 }
0x1376   :  { %v1767_v53 = vpop.permute.xlu0 %1766  ;;  %v1992_v52 = vld [vmem:[#allocation3 + $0x30] sm:$0xff] }
0x1377   :  { %1770 = vst.msk [vmem:[#allocation4 + $0x8] sm:$0xff] %vm244_vm2, %v1767_v53  ;;  %2649 = vmatmul.mubr.msk.f32.vlgmr.msra.gmra.mrb[26].mxu1 %vm244_vm2, %v1767_v53 }
0x137e   :  { %v1999_v32 = vld [vmem:[#allocation4 + $0x8] sm:$0xff] }
0x1442   :  { %v1844_v54 = vpop.f32.mrb[18].mxu0 }
0x1443   :  { %v1848_v55 = vadd.f32 %v1844_v54, %v216_v12  ;;  %v2639_v56 = vpop.f32.mrb[19].mxu0  ;;  %v2370_v12 = vld [vmem:[%s3544_s7] ss:$0 sm:$0xff] }
0x1445   :  { %2939 = vtanh.f32 %v1848_v55  ;;  %v2352_v62 = vmul.f32 -1.442695, %v1848_v55 }
0x144a   :  { %v1922_v58 = vpop.f32.mrb[26].mxu1 }
0x144b   :  { %v1926_v59 = vadd.f32 %v1922_v58, %v176_v57  ;;  %v2650_v26 = vpop.f32.mrb[27].mxu1 }
0x144d   :  { %2941 = vtanh.f32 %v1926_v59  ;;  %v2353_v37 = vmul.f32 -1.442695, %v1926_v59 }
0x144e   :  { %2943 = vpow2.f32 %v2352_v62 }
0x144f   :  { %v2940_v60 = vpop.eup %2939  ;;  %2945 = vpow2.f32 %v2353_v37 }
0x1450   :  { %1936 = vrot.lane.b32.xlu1 %v2940_v60, %s3034_s2 }
0x1457   :  { %v2942_v61 = vpop.eup %2941 }
0x1458   :  { %1960 = vrot.lane.b32.xlu0 %v2942_v61, %s3034_s2  ;;  %v2944_v38 = vpop.eup %2943 }
0x1459   :  { %v1930_v63 = vadd.f32 1.0, %v2944_v38  ;;  %v2946_v8 = vpop.eup %2945 }
0x145a   :  { %v1954_v1 = vadd.f32 1.0, %v2946_v8 }
0x145b   :  { %2947 = vrcp.f32 %v1930_v63 }
0x145c   :  { %2949 = vrcp.f32 %v1954_v1 }
0x1465   :  { %v2948_v29 = vpop.eup %2947 }
0x1466   :  { %v2950_v3 = vpop.eup %2949  ;;  %v1934_v9 = vmul.f32 %v2948_v29, %v3447_v16 }
0x1467   :  { %v1958_v7 = vmul.f32 %v2950_v3, %v3450_v34 }
0x14c2   :  { %v1937_v45 = vpop.permute.xlu1 %1936 }
0x14c3   :  { %v1939_v2 = vmul.f32 %v2948_v29, %v1937_v45 }
0x14c5   :  { %1941 = vrot.lane.b32.xlu1 %v1939_v2, %s3035_s13 }
0x14ca   :  { %v1961_v4 = vpop.permute.xlu0 %1960 }
0x14cb   :  { %v1963_v5 = vmul.f32 %v2950_v3, %v1961_v4 }
0x14cd   :  { %1965 = vrot.lane.b32.xlu0 %v1963_v5, %s3035_s13 }
0x1537   :  { %v1942_v11 = vpop.permute.xlu1 %1941 }
0x1538   :  { %v1944_v13 = vadd.f32 %v1942_v11, %v1934_v9 }
0x153a   :  { %2951 = vtanh.f32 %v1944_v13 }
0x153f   :  { %v1966_v0 = vpop.permute.xlu0 %1965 }
0x1540   :  { %v1968_v35 = vadd.f32 %v1966_v0, %v1958_v7 }
0x1542   :  { %2953 = vtanh.f32 %v1968_v35 }
0x1544   :  { %v2952_v14 = vpop.eup %2951 }
0x1545   :  { %1947 = vrot.lane.b32.xlu1 %v2952_v14, %s3034_s2 }
0x154c   :  { %v2954_v15 = vpop.eup %2953 }
0x154d   :  { %1971 = vrot.lane.b32.xlu0 %v2954_v15, %s3034_s2  ;;  %s2296_s2 = sshll.u32 %s3036_s12, 4  ;;  %s2297_s2 = int_to_ptr.vmem [resolvable:$true] %s2296_s2 }
0x154e   :  { %s2999_s7 = scalar_lea.vmem %s2297_s2, 1024  ;;  %p3004_p3 = scmp.lt.s32.totalorder %s2297_s2, %s2297_s2 }
0x154f   :  { %p3000_p2 = scmp.ne.s32.totalorder %s2297_s2, %s2999_s7  ;;  %p3005_p4 = scmp.lt.s32.totalorder %s2999_s7, %s2999_s7 }
0x1551   :  { %p3006_p5 = por %p3005_p4, %p3004_p3 }
0x1553   :  { %p3007_p6 = pnand %p3006_p5, %p3000_p2 }
0x15b7   :  { %v1948_v23 = vpop.permute.xlu1 %1947 }
0x15b8   :  { %v1950_v25 = vmul.f32 %v2948_v29, %v1948_v23 }
0x15ba   :  { %1976 = vrot.lane.b32.xlu1 %v1950_v25, %s3035_s13 }
0x15bf   :  { %v1972_v16 = vpop.permute.xlu0 %1971 }
0x15c0   :  { %v1974_v33 = vmul.f32 %v2950_v3, %v1972_v16 }
0x15c2   :  { %1982 = vrot.lane.b32.xlu0 %v1974_v33, %s3035_s13 }
0x162c   :  { %v1977_v34 = vpop.permute.xlu1 %1976 }
0x162d   :  { %1980 = vst.msk [vmem:[#allocation3 + $0x38] sm:$0xff] %vm244_vm2, %v1977_v34 }
0x1634   :  { %v1983_v21 = vpop.permute.xlu0 %1982  ;;  %v1993_v53 = vld [vmem:[#allocation3 + $0x38] sm:$0xff] }
0x1635   :  { %1985 = vst.msk [vmem:[#allocation4] sm:$0xff] %vm244_vm2, %v1983_v21 }
0x163c   :  { %v1998_v41 = vld [vmem:[#allocation4] sm:$0xff] }
0x163d   :  { %2659 = vmatprep.mubr.msk.f32.mxu0 %vm244_vm2, %v1998_v41 }
0x163e   :  { %2660 = vmatmul.mubr.msk.f32.vlgmr.msra.gmra.mrb[20].mxu0 %vm244_vm2, %v1999_v32 }
0x163f   :  { %2662 = vmatprep.mubr.msk.f32.mxu0 %vm244_vm2, %v2000_v31  ;;  %2802 = vmatpush3.bf16.msra.mxu0 %v2799_v30 }
0x1640   :  { %2804 = vmatprep.subr.bf16.mxu0 %v2803_v24 }
0x1642   :  { %2663 = vmatmul.mubr.msk.f32.gmra.mrb[22].mxu0 %vm244_vm2, %v2001_v42 }
0x1643   :  { %2665 = vmatprep.mubr.msk.f32.mxu0 %vm244_vm2, %v2002_v43  ;;  %2806 = vmatpush3.bf16.msra.mxu0 %v2803_v24 }
0x1646   :  { %2666 = vmatmul.mubr.msk.f32.gmra.mrb[24].mxu0 %vm244_vm2, %v2003_v44 }
0x1647   :  { %2668 = vmatprep.mubr.msk.f32.mxu0 %vm244_vm2, %v2004_v46 }
0x164a   :  { %2669 = vmatmul.mubr.msk.f32.gmra.mrb[26].mxu0 %vm244_vm2, %v2005_v6 }
0x164b   :  { %2679 = vmatprep.mubr.msk.f32.mxu0 %vm244_vm2, %v1986_v47 }
0x164e   :  { %2680 = vmatmul.mubr.msk.f32.vlgmr.msra.gmra.mrb[20].mxu0 %vm244_vm2, %v1987_v48 }
0x164f   :  { %2682 = vmatprep.mubr.msk.f32.mxu0 %vm244_vm2, %v1988_v36 }
0x1652   :  { %2683 = vmatmul.mubr.msk.f32.gmra.mrb[22].mxu0 %vm244_vm2, %v1989_v49 }
0x1653   :  { %2685 = vmatprep.mubr.msk.f32.mxu0 %vm244_vm2, %v1990_v50 }
0x1656   :  { %2686 = vmatmul.mubr.msk.f32.gmra.mrb[24].mxu0 %vm244_vm2, %v1991_v51 }
0x1657   :  { %2688 = vmatprep.mubr.msk.f32.mxu0 %vm244_vm2, %v1992_v52 }
0x165a   :  { %2689 = vmatmul.mubr.msk.f32.gmra.mrb[26].mxu0 %vm244_vm2, %v1993_v53 }
0x1721   :  { %v2681_v54 = vpop.f32.mrb[20].mxu0 }
0x1722   :  { %v2276_v55 = vadd.f32 %v2681_v54, %v2370_v12  ;;  %v2229_v56 = vpop.f32.mrb[21].mxu0 }
0x1723   :  { %v2275_v57 = vadd.f32 %v2370_v12, %v2229_v56 }
0x1724   :  { %2284 = vst [vmem:[#allocation10 + $0x8] sm:$0xff] %v2276_v55 }
0x1725   :  { %2283 = vst [vmem:[#allocation10] sm:$0xff] %v2275_v57  ;;  %v2684_v58 = vpop.f32.mrb[22].mxu0 }
0x1726   :  { %v2278_v59 = vadd.f32 %v2684_v58, %v2370_v12  ;;  %v2239_v26 = vpop.f32.mrb[23].mxu0 }
0x1727   :  { %v2277_v60 = vadd.f32 %v2370_v12, %v2239_v26 }
0x1728   :  { %2286 = vst [vmem:[#allocation10 + $0x18] sm:$0xff] %v2278_v59 }
0x1729   :  { %2285 = vst [vmem:[#allocation10 + $0x10] sm:$0xff] %v2277_v60  ;;  %v2687_v61 = vpop.f32.mrb[24].mxu0 }
0x172a   :  { %v2280_v62 = vadd.f32 %v2687_v61, %v2370_v12  ;;  %v2249_v37 = vpop.f32.mrb[25].mxu0 }
0x172b   :  { %v2279_v38 = vadd.f32 %v2370_v12, %v2249_v37 }
0x172c   :  { %2288 = vst [vmem:[#allocation10 + $0x28] sm:$0xff] %v2280_v62 }
0x172d   :  { %2287 = vst [vmem:[#allocation10 + $0x20] sm:$0xff] %v2279_v38  ;;  %v2690_v63 = vpop.f32.mrb[26].mxu0 }
0x172e   :  { %v2282_v8 = vadd.f32 %v2690_v63, %v2370_v12  ;;  %v2259_v1 = vpop.f32.mrb[27].mxu0 }
0x172f   :  { %v2281_v29 = vadd.f32 %v2370_v12, %v2259_v1 }
0x1730   :  { %2290 = vst [vmem:[#allocation10 + $0x38] sm:$0xff] %v2282_v8 }
0x1731   :  { %2289 = vst [vmem:[#allocation10 + $0x30] sm:$0xff] %v2281_v29 }
0x1732   :  { %3010 = shalt.err (!%p3007_p6)
}
0x1733   :  { %s3011_s14 = scalar_lea.hbm %s3545_s8, 1024 }
0x1734   :  { %p3012_p7 = scmp.ne.s32.totalorder %s3545_s8, %s3011_s14  ;;  %p3015_p8 = scmp.lt.u32.totalorder %s3011_s14, %s3545_s8 }
0x1736   :  { %p3017_p9 = pnand %p3015_p8, %p3012_p7 }
0x1738   :  { %3020 = shalt.err (!%p3017_p9)
}
0x1739   :  { %2302 = dma.vmem_to_hbm [thread:$0]  %s2297_s2, 1024, %s3545_s8, [#allocation7], %s3028_s15, %s3028_s15, %s3029_s16  }
0x173a   :  { %3025 = dma.done.wait [#allocation7], 1024  }
0x173b   :  { %3026 = vsyncadd [#allocation7], 4294966272 }
0x173c   :  { %2306 = vsyncpa [#allocation6], 1 }
0x173d   :  { %2307 = vsyncpa [#allocation9], 1 }
0x173e   :  { %2308 = vsyncpa [#allocation7], 1 }

</bundles_post_ra>
